<compile_context>
chip_gen: v5e
topology: v5e:2x2
jax: 0.10.0
libtpu: 0.0.40
codegen_flags: <defaults>
</compile_context>

<pallas_src>
import math

import jax
import jax.numpy as jnp
from jax.experimental import pallas as pl
from jax.experimental.pallas import tpu as pltpu

# ---- small synthetic BERT config (module __init__ loads a real config; we pick small shapes) ----
VOCAB = 100
TYPE_VOCAB = 2
MAX_POS = 16
HIDDEN = 32
NUM_LAYERS = 2
NUM_HEADS = 4
HEAD_DIM = HIDDEN // NUM_HEADS
INTERMEDIATE = 64
EPS = 1e-12


def _layernorm(x, gamma, beta):
    mean = jnp.mean(x, axis=-1, keepdims=True)
    var = jnp.mean((x - mean) ** 2, axis=-1, keepdims=True)
    return (x - mean) * jax.lax.rsqrt(var + EPS) * gamma + beta


# ---------------------------------------------------------------------------
# Pallas wrapper: single call, grid over layers only; whole batch per step.
# ---------------------------------------------------------------------------
def bert_encoder_pallas(emb2, neg_mask, params, B, S):
    L = NUM_LAYERS
    H, H3, I = HIDDEN, 3 * HIDDEN, INTERMEDIATE
    BS = B * S

    # ---- kernel (closes over B, S) ----------------------------------------
    def encoder_kernel(emb_ref, mask_ref, eg_ref, eb_ref,
                       wqkv_ref, bqkv_ref, wo_ref, bo_ref, ln1g_ref, ln1b_ref,
                       wi_ref, bi_ref, wo2_ref, bo2_ref, ln2g_ref, ln2b_ref,
                       out_ref, h_scr):
        l = pl.program_id(0)

        # Fold the embedding LayerNorm into the first layer iteration.
        @pl.when(l == 0)
        def _():
            h_scr[...] = _layernorm(emb_ref[...], eg_ref[...], eb_ref[...])

        h2 = h_scr[...]                                   # (BS, H) f32, VMEM-resident
        h_bf = h2.astype(jnp.bfloat16)

        # Fused QKV projection over the whole flattened batch (M = B*S rows).
        qkv = jnp.dot(h_bf, wqkv_ref[...],
                      preferred_element_type=jnp.float32) + bqkv_ref[...]   # (BS, 3H)
        qkv_bf = qkv.astype(jnp.bfloat16)                 # cast ONCE before head loop

        negb = mask_ref[...]                              # (BS, BS) block-diag additive mask

        # Per-head attention (static small loop). 1/sqrt(head_dim) folded into Wq/bq.
        ctx_heads = []
        for head in range(NUM_HEADS):
            q_sl = slice(0 * HIDDEN + head * HEAD_DIM, 0 * HIDDEN + (head + 1) * HEAD_DIM)
            k_sl = slice(1 * HIDDEN + head * HEAD_DIM, 1 * HIDDEN + (head + 1) * HEAD_DIM)
            v_sl = slice(2 * HIDDEN + head * HEAD_DIM, 2 * HIDDEN + (head + 1) * HEAD_DIM)
            qh = qkv_bf[:, q_sl]                          # (BS, hd) bf16
            kh = qkv_bf[:, k_sl]
            vh = qkv_bf[:, v_sl]
            # q @ k^T via dot_general (contract last dims; no explicit transpose).
            s = jax.lax.dot_general(qh, kh, (((1,), (1,)), ((), ())),
                                    preferred_element_type=jnp.float32) + negb
            s = s - jnp.max(s, axis=-1, keepdims=True)
            p = jnp.exp(s)                                # cross-sequence entries -> exactly 0
            p = p * pl.reciprocal(jnp.sum(p, axis=-1, keepdims=True), approx=True)
            ctx_heads.append(jnp.dot(p.astype(jnp.bfloat16), vh,
                                     preferred_element_type=jnp.float32))   # (BS, hd)

        # Heads stay as values: one concat, one Wo matmul (no scratch, no masked stores).
        ctx = jnp.concatenate(ctx_heads, axis=-1)         # (BS, H)
        attn = jnp.dot(ctx.astype(jnp.bfloat16), wo_ref[...],
                       preferred_element_type=jnp.float32) + bo_ref[...]    # (BS, H)
        h1 = _layernorm(h2 + attn, ln1g_ref[...], ln1b_ref[...])

        # FFN
        ff = jnp.dot(h1.astype(jnp.bfloat16), wi_ref[...],
                     preferred_element_type=jnp.float32) + bi_ref[...]      # (BS, I)
        # GELU (tanh approximation). HF BERT "gelu" is erf-based; tanh approx used for
        # robust Mosaic lowering.  # TODO(synk): switch to exact erf GELU if needed.
        ff = 0.5 * ff * (1.0 + jnp.tanh(0.7978845608028654 * (ff + 0.044715 * ff ** 3)))
        out2 = jnp.dot(ff.astype(jnp.bfloat16), wo2_ref[...],
                       preferred_element_type=jnp.float32) + bo2_ref[...]   # (BS, H)

        h_new = _layernorm(h1 + out2, ln2g_ref[...], ln2b_ref[...])
        h_scr[...] = h_new                                # carry to next layer iteration

        # Emit only the [CLS] rows (rows 0, S, 2S, ...) at the last layer.
        @pl.when(l == pl.num_programs(0) - 1)
        def _():
            cls = jnp.concatenate(
                [h_new[b * S:b * S + 1, :] for b in range(B)], axis=0)      # (B, H)
            out_ref[...] = cls

    # ---- specs -------------------------------------------------------------
    def full2(shape):
        return pl.BlockSpec(shape, lambda l: (0, 0))

    def per_layer(d1, d2):
        return pl.BlockSpec((None, d1, d2), lambda l: (l, 0, 0))

    in_specs = [
        full2((BS, H)),                      # emb2 (B*S, H)
        full2((BS, BS)),                     # block-diagonal additive mask
        full2((1, H)), full2((1, H)),        # embedding LN gamma/beta
        per_layer(H, H3), per_layer(1, H3),  # wqkv, bqkv
        per_layer(H, H), per_layer(1, H),    # wo, bo
        per_layer(1, H), per_layer(1, H),    # ln1 gamma/beta
        per_layer(H, I), per_layer(1, I),    # wi, bi
        per_layer(I, H), per_layer(1, H),    # wo2, bo2
        per_layer(1, H), per_layer(1, H),    # ln2 gamma/beta
    ]

    args = [emb2, neg_mask, params['emb_ln_g'], params['emb_ln_b'],
            params['wqkv'], params['bqkv'], params['wo'], params['bo'],
            params['ln1_g'], params['ln1_b'],
            params['wi'], params['bi'], params['wo2'], params['bo2'],
            params['ln2_g'], params['ln2_b']]

    return pl.pallas_call(
        encoder_kernel,
        out_shape=jax.ShapeDtypeStruct((B, H), jnp.float32),     # [CLS] rows only
        grid_spec=pltpu.PrefetchScalarGridSpec(
            num_scalar_prefetch=0,
            grid=(L,),
            in_specs=in_specs,
            out_specs=full2((B, H)),
            scratch_shapes=[pltpu.VMEM((BS, H), jnp.float32)],   # resident hidden state
        ),
        compiler_params=pltpu.CompilerParams(
            dimension_semantics=("arbitrary",)),                 # layer axis is a carry
    )(*args)


# ---------------------------------------------------------------------------
# Deterministic parameter construction (synthetic, no checkpoint loading)
# ---------------------------------------------------------------------------
def make_params():
    key = jax.random.PRNGKey(0)

    def nrm(k, shape):
        return 0.02 * jax.random.normal(k, shape, dtype=jnp.float32)

    key, k_w, k_p, k_t = jax.random.split(key, 4)
    params = {
        'word_emb': nrm(k_w, (VOCAB, HIDDEN)),
        'pos_emb':  nrm(k_p, (MAX_POS, HIDDEN)),
        'type_emb': nrm(k_t, (TYPE_VOCAB, HIDDEN)),
        'emb_ln_g': jnp.ones((1, HIDDEN), jnp.float32),
        'emb_ln_b': jnp.zeros((1, HIDDEN), jnp.float32),
    }

    scale = 1.0 / math.sqrt(HEAD_DIM)      # folded into Wq AND bq at build time
    wqkv_l, bqkv_l, wo_l, bo_l = [], [], [], []
    ln1g_l, ln1b_l, wi_l, bi_l, wo2_l, bo2_l, ln2g_l, ln2b_l = [], [], [], [], [], [], [], []
    for li in range(NUM_LAYERS):
        lk = jax.random.fold_in(key, li)
        k = jax.random.split(lk, 6)
        wq = nrm(k[0], (HIDDEN, HIDDEN)) * scale
        wk = nrm(k[1], (HIDDEN, HIDDEN))
        wv = nrm(k[2], (HIDDEN, HIDDEN))
        bq = jnp.zeros((1, HIDDEN), jnp.float32) * scale   # scale bq with Wq (real ckpts too)
        bk = jnp.zeros((1, HIDDEN), jnp.float32)
        bv = jnp.zeros((1, HIDDEN), jnp.float32)
        wqkv_l.append(jnp.concatenate([wq, wk, wv], axis=1))          # (H, 3H)
        bqkv_l.append(jnp.concatenate([bq, bk, bv], axis=1))          # (1, 3H)
        wo_l.append(nrm(k[3], (HIDDEN, HIDDEN)))
        bo_l.append(jnp.zeros((1, HIDDEN), jnp.float32))
        ln1g_l.append(jnp.ones((1, HIDDEN), jnp.float32))
        ln1b_l.append(jnp.zeros((1, HIDDEN), jnp.float32))
        wi_l.append(nrm(k[4], (HIDDEN, INTERMEDIATE)))
        bi_l.append(jnp.zeros((1, INTERMEDIATE), jnp.float32))
        wo2_l.append(nrm(k[5], (INTERMEDIATE, HIDDEN)))
        bo2_l.append(jnp.zeros((1, HIDDEN), jnp.float32))
        ln2g_l.append(jnp.ones((1, HIDDEN), jnp.float32))
        ln2b_l.append(jnp.zeros((1, HIDDEN), jnp.float32))

    params.update({
        # matmul weights stored bf16 (MXU-native); biases / LN params stay f32
        'wqkv': jnp.stack(wqkv_l).astype(jnp.bfloat16),   # (L, H, 3H)
        'bqkv': jnp.stack(bqkv_l),                        # (L, 1, 3H)
        'wo':   jnp.stack(wo_l).astype(jnp.bfloat16),     # (L, H, H)
        'bo':   jnp.stack(bo_l),                          # (L, 1, H)
        'ln1_g': jnp.stack(ln1g_l), 'ln1_b': jnp.stack(ln1b_l),
        'wi':   jnp.stack(wi_l).astype(jnp.bfloat16),     # (L, H, I)
        'bi':   jnp.stack(bi_l),                          # (L, 1, I)
        'wo2':  jnp.stack(wo2_l).astype(jnp.bfloat16),    # (L, I, H)
        'bo2':  jnp.stack(bo2_l),                         # (L, 1, H)
        'ln2_g': jnp.stack(ln2g_l), 'ln2_b': jnp.stack(ln2b_l),
    })
    return params


# ---------------------------------------------------------------------------
# BertTextNet.forward: tokens, segments, input_masks -> last_hidden_state[:, 0, :]
# ---------------------------------------------------------------------------
def bert_text_net_forward(params, tokens, segments, input_masks):
    B, S = tokens.shape
    BS = B * S
    # embedding gathers (plain-JAX glue)
    emb = (params['word_emb'][tokens]
           + params['pos_emb'][:S][None, :, :]
           + params['type_emb'][segments])                       # (B, S, H)
    emb2 = emb.reshape(BS, HIDDEN).astype(jnp.float32)

    # Block-diagonal additive attention mask on the flattened (B*S) axis:
    # key j (in sequence b') is visible to query i (in sequence b) iff b == b' and
    # input_masks[b', j] == 1; otherwise -10000 (exp underflows to exactly 0).
    key_mask = input_masks.astype(jnp.float32).reshape(BS)       # (BS,)
    row_batch = jnp.repeat(jnp.arange(B), S)                     # (BS,)
    same_seq = (row_batch[:, None] == row_batch[None, :]).astype(jnp.float32)
    allowed = same_seq * key_mask[None, :]                       # (BS, BS)
    neg_mask = (1.0 - allowed) * -10000.0

    # kernel emits only [CLS] rows: (B, H)
    return bert_encoder_pallas(emb2, neg_mask, params, B, S)


if __name__ == "__main__":
    params = make_params()

    B, S = 2, 8
    key = jax.random.PRNGKey(0)
    k_tok, _ = jax.random.split(key)
    tokens = jax.random.randint(k_tok, (B, S), 0, VOCAB, dtype=jnp.int32)
    segments = jnp.concatenate(
        [jnp.zeros((B, S // 2), jnp.int32), jnp.ones((B, S // 2), jnp.int32)], axis=1)
    input_masks = jnp.array([[1, 1, 1, 1, 1, 1, 1, 1],
                             [1, 1, 1, 1, 1, 1, 0, 0]], jnp.int32)

    text_embeddings = bert_text_net_forward(params, tokens, segments, input_masks)
    jax.block_until_ready(text_embeddings)
    assert text_embeddings.shape == (B, HIDDEN)
    print("KERNEL_OK")
</pallas_src>

<mosaic_0001>
module attributes {stable_mosaic.version = 11 : i64} {
  func.func @encoder_kernel(%arg0: i32, %arg1: memref<16x32xf32, #tpu.memory_space<vmem>>, %arg2: memref<16x16xf32, #tpu.memory_space<vmem>>, %arg3: memref<1x32xf32, #tpu.memory_space<vmem>>, %arg4: memref<1x32xf32, #tpu.memory_space<vmem>>, %arg5: memref<1x32x96xbf16, #tpu.memory_space<vmem>>, %arg6: memref<1x1x96xf32, #tpu.memory_space<vmem>>, %arg7: memref<1x32x32xbf16, #tpu.memory_space<vmem>>, %arg8: memref<1x1x32xf32, #tpu.memory_space<vmem>>, %arg9: memref<1x1x32xf32, #tpu.memory_space<vmem>>, %arg10: memref<1x1x32xf32, #tpu.memory_space<vmem>>, %arg11: memref<1x32x64xbf16, #tpu.memory_space<vmem>>, %arg12: memref<1x1x64xf32, #tpu.memory_space<vmem>>, %arg13: memref<1x64x32xbf16, #tpu.memory_space<vmem>>, %arg14: memref<1x1x32xf32, #tpu.memory_space<vmem>>, %arg15: memref<1x1x32xf32, #tpu.memory_space<vmem>>, %arg16: memref<1x1x32xf32, #tpu.memory_space<vmem>>, %arg17: memref<2x32xf32, #tpu.memory_space<vmem>>, %arg18: memref<16x32xf32, #tpu.memory_space<vmem>>) attributes {dimension_semantics = [#tpu.dimension_semantics<arbitrary>], iteration_bounds = array<i64: 2>, scalar_prefetch = 0 : i64, scratch_operands = 1 : i64, tpu.core_type = #tpu.core_type<tc>, window_params = [{pipeline_mode = #tpu.pipeline_mode<synchronous>, transform_indices = @transform_0, window_bounds = array<i64: 16, 32>}, {pipeline_mode = #tpu.pipeline_mode<synchronous>, transform_indices = @transform_1, window_bounds = array<i64: 16, 16>}, {pipeline_mode = #tpu.pipeline_mode<synchronous>, transform_indices = @transform_2, window_bounds = array<i64: 1, 32>}, {pipeline_mode = #tpu.pipeline_mode<synchronous>, transform_indices = @transform_3, window_bounds = array<i64: 1, 32>}, {transform_indices = @transform_4, window_bounds = array<i64: 1, 32, 96>}, {transform_indices = @transform_5, window_bounds = array<i64: 1, 1, 96>}, {transform_indices = @transform_6, window_bounds = array<i64: 1, 32, 32>}, {transform_indices = @transform_7, window_bounds = array<i64: 1, 1, 32>}, {transform_indices = @transform_8, window_bounds = array<i64: 1, 1, 32>}, {transform_indices = @transform_9, window_bounds = array<i64: 1, 1, 32>}, {transform_indices = @transform_10, window_bounds = array<i64: 1, 32, 64>}, {transform_indices = @transform_11, window_bounds = array<i64: 1, 1, 64>}, {transform_indices = @transform_12, window_bounds = array<i64: 1, 64, 32>}, {transform_indices = @transform_13, window_bounds = array<i64: 1, 1, 32>}, {transform_indices = @transform_14, window_bounds = array<i64: 1, 1, 32>}, {transform_indices = @transform_15, window_bounds = array<i64: 1, 1, 32>}, {pipeline_mode = #tpu.pipeline_mode<synchronous>, transform_indices = @transform_16, window_bounds = array<i64: 2, 32>}]} {
    %c0_i32 = arith.constant 0 : i32
    %0 = arith.cmpi eq, %arg0, %c0_i32 : i32
    %1 = arith.extui %0 : i1 to i32
    %c0_i32_0 = arith.constant 0 : i32
    %2 = arith.cmpi ne, %1, %c0_i32_0 : i32
    scf.if %2 {
      %c0_76 = arith.constant 0 : index
      %c0_77 = arith.constant 0 : index
      %178 = vector.load %arg1[%c0_76, %c0_77] : memref<16x32xf32, #tpu.memory_space<vmem>>, vector<16x32xf32>
      %c0_78 = arith.constant 0 : index
      %c0_79 = arith.constant 0 : index
      %179 = vector.load %arg3[%c0_78, %c0_79] : memref<1x32xf32, #tpu.memory_space<vmem>>, vector<1x32xf32>
      %c0_80 = arith.constant 0 : index
      %c0_81 = arith.constant 0 : index
      %180 = vector.load %arg4[%c0_80, %c0_81] : memref<1x32xf32, #tpu.memory_space<vmem>>, vector<1x32xf32>
      %cst_82 = arith.constant dense<0.000000e+00> : vector<16xf32>
      %181 = vector.multi_reduction <add>, %178, %cst_82 [1] : vector<16x32xf32> to vector<16xf32>
      %182 = vector.shape_cast %181 : vector<16xf32> to vector<16x1xf32>
      %cst_83 = arith.constant 3.200000e+01 : f32
      %183 = vector.broadcast %cst_83 : f32 to vector<16x1xf32>
      %184 = arith.divf %182, %183 : vector<16x1xf32>
      %185 = vector.broadcast %184 : vector<16x1xf32> to vector<16x32xf32>
      %186 = arith.subf %178, %185 : vector<16x32xf32>
      %187 = arith.mulf %186, %186 : vector<16x32xf32>
      %cst_84 = arith.constant dense<0.000000e+00> : vector<16xf32>
      %188 = vector.multi_reduction <add>, %187, %cst_84 [1] : vector<16x32xf32> to vector<16xf32>
      %189 = vector.shape_cast %188 : vector<16xf32> to vector<16x1xf32>
      %cst_85 = arith.constant 3.200000e+01 : f32
      %190 = vector.broadcast %cst_85 : f32 to vector<16x1xf32>
      %191 = arith.divf %189, %190 : vector<16x1xf32>
      %192 = vector.broadcast %184 : vector<16x1xf32> to vector<16x32xf32>
      %193 = arith.subf %178, %192 : vector<16x32xf32>
      %cst_86 = arith.constant 9.99999996E-13 : f32
      %194 = vector.broadcast %cst_86 : f32 to vector<16x1xf32>
      %195 = arith.addf %191, %194 : vector<16x1xf32>
      %196 = math.rsqrt %195 : vector<16x1xf32>
      %197 = vector.broadcast %196 : vector<16x1xf32> to vector<16x32xf32>
      %198 = arith.mulf %193, %197 : vector<16x32xf32>
      %199 = vector.broadcast %179 : vector<1x32xf32> to vector<16x32xf32>
      %200 = arith.mulf %198, %199 : vector<16x32xf32>
      %201 = vector.broadcast %180 : vector<1x32xf32> to vector<16x32xf32>
      %202 = arith.addf %200, %201 : vector<16x32xf32>
      %c0_87 = arith.constant 0 : index
      %c0_88 = arith.constant 0 : index
      %203 = vector.load %arg18[%c0_87, %c0_88] : memref<16x32xf32, #tpu.memory_space<vmem>>, vector<16x32xf32>
      tpu.vector_store %arg18[%c0_87, %c0_88], %202 {strides = array<i32>} : memref<16x32xf32, #tpu.memory_space<vmem>>, vector<16x32xf32>,
    } else {
    }
    %c0 = arith.constant 0 : index
    %c0_1 = arith.constant 0 : index
    %3 = vector.load %arg18[%c0, %c0_1] : memref<16x32xf32, #tpu.memory_space<vmem>>, vector<16x32xf32>
    %4 = arith.truncf %3 : vector<16x32xf32> to vector<16x32xbf16>
    %c0_2 = arith.constant 0 : index
    %c0_3 = arith.constant 0 : index
    %c0_4 = arith.constant 0 : index
    %5 = vector.load %arg5[%c0_2, %c0_3, %c0_4] : memref<1x32x96xbf16, #tpu.memory_space<vmem>>, vector<1x32x96xbf16>
    %6 = vector.shape_cast %5 : vector<1x32x96xbf16> to vector<32x96xbf16>
    %cst = arith.constant dense<0.000000e+00> : vector<16x96xf32>
    %7 = tpu.matmul %4, %6, %cst {dimension_numbers = #tpu.dot_dimension_numbers<[1], [0], [0], [1], [0, 0, 1, 1], [], []>} : vector<16x32xbf16>, vector<32x96xbf16>, vector<16x96xf32> -> vector<16x96xf32>
    %c0_5 = arith.constant 0 : index
    %c0_6 = arith.constant 0 : index
    %c0_7 = arith.constant 0 : index
    %8 = vector.load %arg6[%c0_5, %c0_6, %c0_7] : memref<1x1x96xf32, #tpu.memory_space<vmem>>, vector<1x1x96xf32>
    %9 = vector.shape_cast %8 : vector<1x1x96xf32> to vector<1x96xf32>
    %10 = vector.broadcast %9 : vector<1x96xf32> to vector<16x96xf32>
    %11 = arith.addf %7, %10 : vector<16x96xf32>
    %12 = arith.truncf %11 : vector<16x96xf32> to vector<16x96xbf16>
    %c0_8 = arith.constant 0 : index
    %c0_9 = arith.constant 0 : index
    %13 = vector.load %arg2[%c0_8, %c0_9] : memref<16x16xf32, #tpu.memory_space<vmem>>, vector<16x16xf32>
    %14 = vector.extract_strided_slice %12 {offsets = [0, 0], sizes = [16, 8], strides = [1, 1]} : vector<16x96xbf16> to vector<16x8xbf16>
    %15 = vector.extract_strided_slice %12 {offsets = [0, 32], sizes = [16, 8], strides = [1, 1]} : vector<16x96xbf16> to vector<16x8xbf16>
    %16 = vector.extract_strided_slice %12 {offsets = [0, 64], sizes = [16, 8], strides = [1, 1]} : vector<16x96xbf16> to vector<16x8xbf16>
    %cst_10 = arith.constant dense<0.000000e+00> : vector<16x16xf32>
    %17 = tpu.matmul %14, %15, %cst_10 {dimension_numbers = #tpu.dot_dimension_numbers<[1], [1], [0], [0], [0, 0, 1, 0], [], []>} : vector<16x8xbf16>, vector<16x8xbf16>, vector<16x16xf32> -> vector<16x16xf32>
    %18 = arith.addf %17, %13 : vector<16x16xf32>
    %cst_11 = arith.constant dense<0xFF800000> : vector<16xf32>
    %19 = vector.multi_reduction <maximumf>, %18, %cst_11 [1] : vector<16x16xf32> to vector<16xf32>
    %20 = vector.shape_cast %19 : vector<16xf32> to vector<16x1xf32>
    %21 = vector.broadcast %20 : vector<16x1xf32> to vector<16x16xf32>
    %22 = arith.subf %18, %21 : vector<16x16xf32>
    %23 = math.exp %22 : vector<16x16xf32>
    %cst_12 = arith.constant dense<0.000000e+00> : vector<16xf32>
    %24 = vector.multi_reduction <add>, %23, %cst_12 [1] : vector<16x16xf32> to vector<16xf32>
    %25 = vector.shape_cast %24 : vector<16xf32> to vector<16x1xf32>
    %26 = tpu.reciprocal %25 {approx = true} : vector<16x1xf32> -> vector<16x1xf32>
    %27 = vector.broadcast %26 : vector<16x1xf32> to vector<16x16xf32>
    %28 = arith.mulf %23, %27 : vector<16x16xf32>
    %29 = arith.truncf %28 : vector<16x16xf32> to vector<16x16xbf16>
    %cst_13 = arith.constant dense<0.000000e+00> : vector<16x8xf32>
    %30 = tpu.matmul %29, %16, %cst_13 {dimension_numbers = #tpu.dot_dimension_numbers<[1], [0], [0], [1], [0, 0, 1, 1], [], []>} : vector<16x16xbf16>, vector<16x8xbf16>, vector<16x8xf32> -> vector<16x8xf32>
    %31 = vector.extract_strided_slice %12 {offsets = [0, 8], sizes = [16, 8], strides = [1, 1]} : vector<16x96xbf16> to vector<16x8xbf16>
    %32 = vector.extract_strided_slice %12 {offsets = [0, 40], sizes = [16, 8], strides = [1, 1]} : vector<16x96xbf16> to vector<16x8xbf16>
    %33 = vector.extract_strided_slice %12 {offsets = [0, 72], sizes = [16, 8], strides = [1, 1]} : vector<16x96xbf16> to vector<16x8xbf16>
    %cst_14 = arith.constant dense<0.000000e+00> : vector<16x16xf32>
    %34 = tpu.matmul %31, %32, %cst_14 {dimension_numbers = #tpu.dot_dimension_numbers<[1], [1], [0], [0], [0, 0, 1, 0], [], []>} : vector<16x8xbf16>, vector<16x8xbf16>, vector<16x16xf32> -> vector<16x16xf32>
    %35 = arith.addf %34, %13 : vector<16x16xf32>
    %cst_15 = arith.constant dense<0xFF800000> : vector<16xf32>
    %36 = vector.multi_reduction <maximumf>, %35, %cst_15 [1] : vector<16x16xf32> to vector<16xf32>
    %37 = vector.shape_cast %36 : vector<16xf32> to vector<16x1xf32>
    %38 = vector.broadcast %37 : vector<16x1xf32> to vector<16x16xf32>
    %39 = arith.subf %35, %38 : vector<16x16xf32>
    %40 = math.exp %39 : vector<16x16xf32>
    %cst_16 = arith.constant dense<0.000000e+00> : vector<16xf32>
    %41 = vector.multi_reduction <add>, %40, %cst_16 [1] : vector<16x16xf32> to vector<16xf32>
    %42 = vector.shape_cast %41 : vector<16xf32> to vector<16x1xf32>
    %43 = tpu.reciprocal %42 {approx = true} : vector<16x1xf32> -> vector<16x1xf32>
    %44 = vector.broadcast %43 : vector<16x1xf32> to vector<16x16xf32>
    %45 = arith.mulf %40, %44 : vector<16x16xf32>
    %46 = arith.truncf %45 : vector<16x16xf32> to vector<16x16xbf16>
    %cst_17 = arith.constant dense<0.000000e+00> : vector<16x8xf32>
    %47 = tpu.matmul %46, %33, %cst_17 {dimension_numbers = #tpu.dot_dimension_numbers<[1], [0], [0], [1], [0, 0, 1, 1], [], []>} : vector<16x16xbf16>, vector<16x8xbf16>, vector<16x8xf32> -> vector<16x8xf32>
    %48 = vector.extract_strided_slice %12 {offsets = [0, 16], sizes = [16, 8], strides = [1, 1]} : vector<16x96xbf16> to vector<16x8xbf16>
    %49 = vector.extract_strided_slice %12 {offsets = [0, 48], sizes = [16, 8], strides = [1, 1]} : vector<16x96xbf16> to vector<16x8xbf16>
    %50 = vector.extract_strided_slice %12 {offsets = [0, 80], sizes = [16, 8], strides = [1, 1]} : vector<16x96xbf16> to vector<16x8xbf16>
    %cst_18 = arith.constant dense<0.000000e+00> : vector<16x16xf32>
    %51 = tpu.matmul %48, %49, %cst_18 {dimension_numbers = #tpu.dot_dimension_numbers<[1], [1], [0], [0], [0, 0, 1, 0], [], []>} : vector<16x8xbf16>, vector<16x8xbf16>, vector<16x16xf32> -> vector<16x16xf32>
    %52 = arith.addf %51, %13 : vector<16x16xf32>
    %cst_19 = arith.constant dense<0xFF800000> : vector<16xf32>
    %53 = vector.multi_reduction <maximumf>, %52, %cst_19 [1] : vector<16x16xf32> to vector<16xf32>
    %54 = vector.shape_cast %53 : vector<16xf32> to vector<16x1xf32>
    %55 = vector.broadcast %54 : vector<16x1xf32> to vector<16x16xf32>
    %56 = arith.subf %52, %55 : vector<16x16xf32>
    %57 = math.exp %56 : vector<16x16xf32>
    %cst_20 = arith.constant dense<0.000000e+00> : vector<16xf32>
    %58 = vector.multi_reduction <add>, %57, %cst_20 [1] : vector<16x16xf32> to vector<16xf32>
    %59 = vector.shape_cast %58 : vector<16xf32> to vector<16x1xf32>
    %60 = tpu.reciprocal %59 {approx = true} : vector<16x1xf32> -> vector<16x1xf32>
    %61 = vector.broadcast %60 : vector<16x1xf32> to vector<16x16xf32>
    %62 = arith.mulf %57, %61 : vector<16x16xf32>
    %63 = arith.truncf %62 : vector<16x16xf32> to vector<16x16xbf16>
    %cst_21 = arith.constant dense<0.000000e+00> : vector<16x8xf32>
    %64 = tpu.matmul %63, %50, %cst_21 {dimension_numbers = #tpu.dot_dimension_numbers<[1], [0], [0], [1], [0, 0, 1, 1], [], []>} : vector<16x16xbf16>, vector<16x8xbf16>, vector<16x8xf32> -> vector<16x8xf32>
    %65 = vector.extract_strided_slice %12 {offsets = [0, 24], sizes = [16, 8], strides = [1, 1]} : vector<16x96xbf16> to vector<16x8xbf16>
    %66 = vector.extract_strided_slice %12 {offsets = [0, 56], sizes = [16, 8], strides = [1, 1]} : vector<16x96xbf16> to vector<16x8xbf16>
    %67 = vector.extract_strided_slice %12 {offsets = [0, 88], sizes = [16, 8], strides = [1, 1]} : vector<16x96xbf16> to vector<16x8xbf16>
    %cst_22 = arith.constant dense<0.000000e+00> : vector<16x16xf32>
    %68 = tpu.matmul %65, %66, %cst_22 {dimension_numbers = #tpu.dot_dimension_numbers<[1], [1], [0], [0], [0, 0, 1, 0], [], []>} : vector<16x8xbf16>, vector<16x8xbf16>, vector<16x16xf32> -> vector<16x16xf32>
    %69 = arith.addf %68, %13 : vector<16x16xf32>
    %cst_23 = arith.constant dense<0xFF800000> : vector<16xf32>
    %70 = vector.multi_reduction <maximumf>, %69, %cst_23 [1] : vector<16x16xf32> to vector<16xf32>
    %71 = vector.shape_cast %70 : vector<16xf32> to vector<16x1xf32>
    %72 = vector.broadcast %71 : vector<16x1xf32> to vector<16x16xf32>
    %73 = arith.subf %69, %72 : vector<16x16xf32>
    %74 = math.exp %73 : vector<16x16xf32>
    %cst_24 = arith.constant dense<0.000000e+00> : vector<16xf32>
    %75 = vector.multi_reduction <add>, %74, %cst_24 [1] : vector<16x16xf32> to vector<16xf32>
    %76 = vector.shape_cast %75 : vector<16xf32> to vector<16x1xf32>
    %77 = tpu.reciprocal %76 {approx = true} : vector<16x1xf32> -> vector<16x1xf32>
    %78 = vector.broadcast %77 : vector<16x1xf32> to vector<16x16xf32>
    %79 = arith.mulf %74, %78 : vector<16x16xf32>
    %80 = arith.truncf %79 : vector<16x16xf32> to vector<16x16xbf16>
    %cst_25 = arith.constant dense<0.000000e+00> : vector<16x8xf32>
    %81 = tpu.matmul %80, %67, %cst_25 {dimension_numbers = #tpu.dot_dimension_numbers<[1], [0], [0], [1], [0, 0, 1, 1], [], []>} : vector<16x16xbf16>, vector<16x8xbf16>, vector<16x8xf32> -> vector<16x8xf32>
    %82 = tpu.concatenate %30, %47, %64, %81 in 1 : vector<16x8xf32>, vector<16x8xf32>, vector<16x8xf32>, vector<16x8xf32> -> vector<16x32xf32>
    %83 = arith.truncf %82 : vector<16x32xf32> to vector<16x32xbf16>
    %c0_26 = arith.constant 0 : index
    %c0_27 = arith.constant 0 : index
    %c0_28 = arith.constant 0 : index
    %84 = vector.load %arg7[%c0_26, %c0_27, %c0_28] : memref<1x32x32xbf16, #tpu.memory_space<vmem>>, vector<1x32x32xbf16>
    %85 = vector.shape_cast %84 : vector<1x32x32xbf16> to vector<32x32xbf16>
    %cst_29 = arith.constant dense<0.000000e+00> : vector<16x32xf32>
    %86 = tpu.matmul %83, %85, %cst_29 {dimension_numbers = #tpu.dot_dimension_numbers<[1], [0], [0], [1], [0, 0, 1, 1], [], []>} : vector<16x32xbf16>, vector<32x32xbf16>, vector<16x32xf32> -> vector<16x32xf32>
    %c0_30 = arith.constant 0 : index
    %c0_31 = arith.constant 0 : index
    %c0_32 = arith.constant 0 : index
    %87 = vector.load %arg8[%c0_30, %c0_31, %c0_32] : memref<1x1x32xf32, #tpu.memory_space<vmem>>, vector<1x1x32xf32>
    %88 = vector.shape_cast %87 : vector<1x1x32xf32> to vector<1x32xf32>
    %89 = vector.broadcast %88 : vector<1x32xf32> to vector<16x32xf32>
    %90 = arith.addf %86, %89 : vector<16x32xf32>
    %91 = arith.addf %3, %90 : vector<16x32xf32>
    %c0_33 = arith.constant 0 : index
    %c0_34 = arith.constant 0 : index
    %c0_35 = arith.constant 0 : index
    %92 = vector.load %arg9[%c0_33, %c0_34, %c0_35] : memref<1x1x32xf32, #tpu.memory_space<vmem>>, vector<1x1x32xf32>
    %93 = vector.shape_cast %92 : vector<1x1x32xf32> to vector<1x32xf32>
    %c0_36 = arith.constant 0 : index
    %c0_37 = arith.constant 0 : index
    %c0_38 = arith.constant 0 : index
    %94 = vector.load %arg10[%c0_36, %c0_37, %c0_38] : memref<1x1x32xf32, #tpu.memory_space<vmem>>, vector<1x1x32xf32>
    %95 = vector.shape_cast %94 : vector<1x1x32xf32> to vector<1x32xf32>
    %cst_39 = arith.constant dense<0.000000e+00> : vector<16xf32>
    %96 = vector.multi_reduction <add>, %91, %cst_39 [1] : vector<16x32xf32> to vector<16xf32>
    %97 = vector.shape_cast %96 : vector<16xf32> to vector<16x1xf32>
    %cst_40 = arith.constant 3.200000e+01 : f32
    %98 = vector.broadcast %cst_40 : f32 to vector<16x1xf32>
    %99 = arith.divf %97, %98 : vector<16x1xf32>
    %100 = vector.broadcast %99 : vector<16x1xf32> to vector<16x32xf32>
    %101 = arith.subf %91, %100 : vector<16x32xf32>
    %102 = arith.mulf %101, %101 : vector<16x32xf32>
    %cst_41 = arith.constant dense<0.000000e+00> : vector<16xf32>
    %103 = vector.multi_reduction <add>, %102, %cst_41 [1] : vector<16x32xf32> to vector<16xf32>
    %104 = vector.shape_cast %103 : vector<16xf32> to vector<16x1xf32>
    %cst_42 = arith.constant 3.200000e+01 : f32
    %105 = vector.broadcast %cst_42 : f32 to vector<16x1xf32>
    %106 = arith.divf %104, %105 : vector<16x1xf32>
    %107 = vector.broadcast %99 : vector<16x1xf32> to vector<16x32xf32>
    %108 = arith.subf %91, %107 : vector<16x32xf32>
    %cst_43 = arith.constant 9.99999996E-13 : f32
    %109 = vector.broadcast %cst_43 : f32 to vector<16x1xf32>
    %110 = arith.addf %106, %109 : vector<16x1xf32>
    %111 = math.rsqrt %110 : vector<16x1xf32>
    %112 = vector.broadcast %111 : vector<16x1xf32> to vector<16x32xf32>
    %113 = arith.mulf %108, %112 : vector<16x32xf32>
    %114 = vector.broadcast %93 : vector<1x32xf32> to vector<16x32xf32>
    %115 = arith.mulf %113, %114 : vector<16x32xf32>
    %116 = vector.broadcast %95 : vector<1x32xf32> to vector<16x32xf32>
    %117 = arith.addf %115, %116 : vector<16x32xf32>
    %118 = arith.truncf %117 : vector<16x32xf32> to vector<16x32xbf16>
    %c0_44 = arith.constant 0 : index
    %c0_45 = arith.constant 0 : index
    %c0_46 = arith.constant 0 : index
    %119 = vector.load %arg11[%c0_44, %c0_45, %c0_46] : memref<1x32x64xbf16, #tpu.memory_space<vmem>>, vector<1x32x64xbf16>
    %120 = vector.shape_cast %119 : vector<1x32x64xbf16> to vector<32x64xbf16>
    %cst_47 = arith.constant dense<0.000000e+00> : vector<16x64xf32>
    %121 = tpu.matmul %118, %120, %cst_47 {dimension_numbers = #tpu.dot_dimension_numbers<[1], [0], [0], [1], [0, 0, 1, 1], [], []>} : vector<16x32xbf16>, vector<32x64xbf16>, vector<16x64xf32> -> vector<16x64xf32>
    %c0_48 = arith.constant 0 : index
    %c0_49 = arith.constant 0 : index
    %c0_50 = arith.constant 0 : index
    %122 = vector.load %arg12[%c0_48, %c0_49, %c0_50] : memref<1x1x64xf32, #tpu.memory_space<vmem>>, vector<1x1x64xf32>
    %123 = vector.shape_cast %122 : vector<1x1x64xf32> to vector<1x64xf32>
    %124 = vector.broadcast %123 : vector<1x64xf32> to vector<16x64xf32>
    %125 = arith.addf %121, %124 : vector<16x64xf32>
    %cst_51 = arith.constant 5.000000e-01 : f32
    %126 = vector.broadcast %cst_51 : f32 to vector<16x64xf32>
    %127 = arith.mulf %126, %125 : vector<16x64xf32>
    %128 = arith.mulf %125, %125 : vector<16x64xf32>
    %129 = arith.mulf %125, %128 : vector<16x64xf32>
    %cst_52 = arith.constant 4.471500e-02 : f32
    %130 = vector.broadcast %cst_52 : f32 to vector<16x64xf32>
    %131 = arith.mulf %130, %129 : vector<16x64xf32>
    %132 = arith.addf %125, %131 : vector<16x64xf32>
    %cst_53 = arith.constant 0.797884583 : f32
    %133 = vector.broadcast %cst_53 : f32 to vector<16x64xf32>
    %134 = arith.mulf %133, %132 : vector<16x64xf32>
    %135 = math.tanh %134 : vector<16x64xf32>
    %cst_54 = arith.constant 1.000000e+00 : f32
    %136 = vector.broadcast %cst_54 : f32 to vector<16x64xf32>
    %137 = arith.addf %136, %135 : vector<16x64xf32>
    %138 = arith.mulf %127, %137 : vector<16x64xf32>
    %139 = arith.truncf %138 : vector<16x64xf32> to vector<16x64xbf16>
    %c0_55 = arith.constant 0 : index
    %c0_56 = arith.constant 0 : index
    %c0_57 = arith.constant 0 : index
    %140 = vector.load %arg13[%c0_55, %c0_56, %c0_57] : memref<1x64x32xbf16, #tpu.memory_space<vmem>>, vector<1x64x32xbf16>
    %141 = vector.shape_cast %140 : vector<1x64x32xbf16> to vector<64x32xbf16>
    %cst_58 = arith.constant dense<0.000000e+00> : vector<16x32xf32>
    %142 = tpu.matmul %139, %141, %cst_58 {dimension_numbers = #tpu.dot_dimension_numbers<[1], [0], [0], [1], [0, 0, 1, 1], [], []>} : vector<16x64xbf16>, vector<64x32xbf16>, vector<16x32xf32> -> vector<16x32xf32>
    %c0_59 = arith.constant 0 : index
    %c0_60 = arith.constant 0 : index
    %c0_61 = arith.constant 0 : index
    %143 = vector.load %arg14[%c0_59, %c0_60, %c0_61] : memref<1x1x32xf32, #tpu.memory_space<vmem>>, vector<1x1x32xf32>
    %144 = vector.shape_cast %143 : vector<1x1x32xf32> to vector<1x32xf32>
    %145 = vector.broadcast %144 : vector<1x32xf32> to vector<16x32xf32>
    %146 = arith.addf %142, %145 : vector<16x32xf32>
    %147 = arith.addf %117, %146 : vector<16x32xf32>
    %c0_62 = arith.constant 0 : index
    %c0_63 = arith.constant 0 : index
    %c0_64 = arith.constant 0 : index
    %148 = vector.load %arg15[%c0_62, %c0_63, %c0_64] : memref<1x1x32xf32, #tpu.memory_space<vmem>>, vector<1x1x32xf32>
    %149 = vector.shape_cast %148 : vector<1x1x32xf32> to vector<1x32xf32>
    %c0_65 = arith.constant 0 : index
    %c0_66 = arith.constant 0 : index
    %c0_67 = arith.constant 0 : index
    %150 = vector.load %arg16[%c0_65, %c0_66, %c0_67] : memref<1x1x32xf32, #tpu.memory_space<vmem>>, vector<1x1x32xf32>
    %151 = vector.shape_cast %150 : vector<1x1x32xf32> to vector<1x32xf32>
    %cst_68 = arith.constant dense<0.000000e+00> : vector<16xf32>
    %152 = vector.multi_reduction <add>, %147, %cst_68 [1] : vector<16x32xf32> to vector<16xf32>
    %153 = vector.shape_cast %152 : vector<16xf32> to vector<16x1xf32>
    %cst_69 = arith.constant 3.200000e+01 : f32
    %154 = vector.broadcast %cst_69 : f32 to vector<16x1xf32>
    %155 = arith.divf %153, %154 : vector<16x1xf32>
    %156 = vector.broadcast %155 : vector<16x1xf32> to vector<16x32xf32>
    %157 = arith.subf %147, %156 : vector<16x32xf32>
    %158 = arith.mulf %157, %157 : vector<16x32xf32>
    %cst_70 = arith.constant dense<0.000000e+00> : vector<16xf32>
    %159 = vector.multi_reduction <add>, %158, %cst_70 [1] : vector<16x32xf32> to vector<16xf32>
    %160 = vector.shape_cast %159 : vector<16xf32> to vector<16x1xf32>
    %cst_71 = arith.constant 3.200000e+01 : f32
    %161 = vector.broadcast %cst_71 : f32 to vector<16x1xf32>
    %162 = arith.divf %160, %161 : vector<16x1xf32>
    %163 = vector.broadcast %155 : vector<16x1xf32> to vector<16x32xf32>
    %164 = arith.subf %147, %163 : vector<16x32xf32>
    %cst_72 = arith.constant 9.99999996E-13 : f32
    %165 = vector.broadcast %cst_72 : f32 to vector<16x1xf32>
    %166 = arith.addf %162, %165 : vector<16x1xf32>
    %167 = math.rsqrt %166 : vector<16x1xf32>
    %168 = vector.broadcast %167 : vector<16x1xf32> to vector<16x32xf32>
    %169 = arith.mulf %164, %168 : vector<16x32xf32>
    %170 = vector.broadcast %149 : vector<1x32xf32> to vector<16x32xf32>
    %171 = arith.mulf %169, %170 : vector<16x32xf32>
    %172 = vector.broadcast %151 : vector<1x32xf32> to vector<16x32xf32>
    %173 = arith.addf %171, %172 : vector<16x32xf32>
    %c0_73 = arith.constant 0 : index
    %c0_74 = arith.constant 0 : index
    %174 = vector.load %arg18[%c0_73, %c0_74] : memref<16x32xf32, #tpu.memory_space<vmem>>, vector<16x32xf32>
    tpu.vector_store %arg18[%c0_73, %c0_74], %173 {strides = array<i32>} : memref<16x32xf32, #tpu.memory_space<vmem>>, vector<16x32xf32>,
    %c1_i32 = arith.constant 1 : i32
    %175 = arith.cmpi eq, %arg0, %c1_i32 : i32
    %176 = arith.extui %175 : i1 to i32
    %c0_i32_75 = arith.constant 0 : i32
    %177 = arith.cmpi ne, %176, %c0_i32_75 : i32
    scf.if %177 {
      %178 = vector.extract_strided_slice %173 {offsets = [0, 0], sizes = [1, 32], strides = [1, 1]} : vector<16x32xf32> to vector<1x32xf32>
      %179 = vector.extract_strided_slice %173 {offsets = [8, 0], sizes = [1, 32], strides = [1, 1]} : vector<16x32xf32> to vector<1x32xf32>
      %180 = tpu.concatenate %178, %179 in 0 : vector<1x32xf32>, vector<1x32xf32> -> vector<2x32xf32>
      %c0_76 = arith.constant 0 : index
      %c0_77 = arith.constant 0 : index
      %181 = vector.load %arg17[%c0_76, %c0_77] : memref<2x32xf32, #tpu.memory_space<vmem>>, vector<2x32xf32>
      tpu.vector_store %arg17[%c0_76, %c0_77], %180 {strides = array<i32>} : memref<2x32xf32, #tpu.memory_space<vmem>>, vector<2x32xf32>,
    } else {
    }
    return
  }
  func.func @transform_0(%arg0: i32) -> (i32, i32) {
    %c0_i32 = arith.constant 0 : i32
    %c0_i32_0 = arith.constant 0 : i32
    %c0_i32_1 = arith.constant 0 : i32
    return %c0_i32, %c0_i32_0 : i32, i32
  }
  func.func @transform_1(%arg0: i32) -> (i32, i32) {
    %c0_i32 = arith.constant 0 : i32
    %c0_i32_0 = arith.constant 0 : i32
    %c0_i32_1 = arith.constant 0 : i32
    return %c0_i32, %c0_i32_0 : i32, i32
  }
  func.func @transform_2(%arg0: i32) -> (i32, i32) {
    %c0_i32 = arith.constant 0 : i32
    %c0_i32_0 = arith.constant 0 : i32
    %c0_i32_1 = arith.constant 0 : i32
    return %c0_i32, %c0_i32_0 : i32, i32
  }
  func.func @transform_3(%arg0: i32) -> (i32, i32) {
    %c0_i32 = arith.constant 0 : i32
    %c0_i32_0 = arith.constant 0 : i32
    %c0_i32_1 = arith.constant 0 : i32
    return %c0_i32, %c0_i32_0 : i32, i32
  }
  func.func @transform_4(%arg0: i32) -> (i32, i32, i32) {
    %c0_i32 = arith.constant 0 : i32
    %c0_i32_0 = arith.constant 0 : i32
    %c0_i32_1 = arith.constant 0 : i32
    return %arg0, %c0_i32, %c0_i32_0 : i32, i32, i32
  }
  func.func @transform_5(%arg0: i32) -> (i32, i32, i32) {
    %c0_i32 = arith.constant 0 : i32
    %c0_i32_0 = arith.constant 0 : i32
    %c0_i32_1 = arith.constant 0 : i32
    return %arg0, %c0_i32, %c0_i32_0 : i32, i32, i32
  }
  func.func @transform_6(%arg0: i32) -> (i32, i32, i32) {
    %c0_i32 = arith.constant 0 : i32
    %c0_i32_0 = arith.constant 0 : i32
    %c0_i32_1 = arith.constant 0 : i32
    return %arg0, %c0_i32, %c0_i32_0 : i32, i32, i32
  }
  func.func @transform_7(%arg0: i32) -> (i32, i32, i32) {
    %c0_i32 = arith.constant 0 : i32
    %c0_i32_0 = arith.constant 0 : i32
    %c0_i32_1 = arith.constant 0 : i32
    return %arg0, %c0_i32, %c0_i32_0 : i32, i32, i32
  }
  func.func @transform_8(%arg0: i32) -> (i32, i32, i32) {
    %c0_i32 = arith.constant 0 : i32
    %c0_i32_0 = arith.constant 0 : i32
    %c0_i32_1 = arith.constant 0 : i32
    return %arg0, %c0_i32, %c0_i32_0 : i32, i32, i32
  }
  func.func @transform_9(%arg0: i32) -> (i32, i32, i32) {
    %c0_i32 = arith.constant 0 : i32
    %c0_i32_0 = arith.constant 0 : i32
    %c0_i32_1 = arith.constant 0 : i32
    return %arg0, %c0_i32, %c0_i32_0 : i32, i32, i32
  }
  func.func @transform_10(%arg0: i32) -> (i32, i32, i32) {
    %c0_i32 = arith.constant 0 : i32
    %c0_i32_0 = arith.constant 0 : i32
    %c0_i32_1 = arith.constant 0 : i32
    return %arg0, %c0_i32, %c0_i32_0 : i32, i32, i32
  }
  func.func @transform_11(%arg0: i32) -> (i32, i32, i32) {
    %c0_i32 = arith.constant 0 : i32
    %c0_i32_0 = arith.constant 0 : i32
    %c0_i32_1 = arith.constant 0 : i32
    return %arg0, %c0_i32, %c0_i32_0 : i32, i32, i32
  }
  func.func @transform_12(%arg0: i32) -> (i32, i32, i32) {
    %c0_i32 = arith.constant 0 : i32
    %c0_i32_0 = arith.constant 0 : i32
    %c0_i32_1 = arith.constant 0 : i32
    return %arg0, %c0_i32, %c0_i32_0 : i32, i32, i32
  }
  func.func @transform_13(%arg0: i32) -> (i32, i32, i32) {
    %c0_i32 = arith.constant 0 : i32
    %c0_i32_0 = arith.constant 0 : i32
    %c0_i32_1 = arith.constant 0 : i32
    return %arg0, %c0_i32, %c0_i32_0 : i32, i32, i32
  }
  func.func @transform_14(%arg0: i32) -> (i32, i32, i32) {
    %c0_i32 = arith.constant 0 : i32
    %c0_i32_0 = arith.constant 0 : i32
    %c0_i32_1 = arith.constant 0 : i32
    return %arg0, %c0_i32, %c0_i32_0 : i32, i32, i32
  }
  func.func @transform_15(%arg0: i32) -> (i32, i32, i32) {
    %c0_i32 = arith.constant 0 : i32
    %c0_i32_0 = arith.constant 0 : i32
    %c0_i32_1 = arith.constant 0 : i32
    return %arg0, %c0_i32, %c0_i32_0 : i32, i32, i32
  }
  func.func @transform_16(%arg0: i32) -> (i32, i32) {
    %c0_i32 = arith.constant 0 : i32
    %c0_i32_0 = arith.constant 0 : i32
    %c0_i32_1 = arith.constant 0 : i32
    return %c0_i32, %c0_i32_0 : i32, i32
  }
}

</mosaic_0001>

<bundles_post_ra>
// kernel: tpu_custom_call.1
= control target key start
LH: loop header
LB: loop body
LE: loop exit
PB: predicated region body
PF: predicated region fallthrough
CT: control target
= control target key end

     0   :  { %s2632_s0 = inlined_call_operand.hbm [shape: f32[16,32], index: 0, kind: input, shape index: {}]   ;;  %s2633_s1 = inlined_call_operand.hbm [shape: f32[16,16], index: 1, kind: input, shape index: {}]   ;;  %s2634_s2 = inlined_call_operand.vmem [shape: f32[1,32], index: 2, kind: input, shape index: {}]   ;;  %s2635_s3 = inlined_call_operand.hbm [shape: f32[1,32], index: 3, kind: input, shape index: {}]   ;;  %s2636_s4 = inlined_call_operand.vmem [shape: bf16[2,32,96], index: 4, kind: input, shape index: {}]   ;;  %s2637_s5 = inlined_call_operand.vmem [shape: f32[2,1,96], index: 5, kind: input, shape index: {}]   ;;  %s2638_s6 = inlined_call_operand.vmem [shape: bf16[2,32,32], index: 6, kind: input, shape index: {}]   ;;  %s2639_s7 = inlined_call_operand.vmem [shape: f32[2,1,32], index: 7, kind: input, shape index: {}]   ;;  %s2640_s8 = inlined_call_operand.vmem [shape: f32[2,1,32], index: 8, kind: input, shape index: {}]   ;;  %s2641_s9 = inlined_call_operand.hbm [shape: f32[2,1,32], index: 9, kind: input, shape index: {}]   ;;  %s2642_s10 = inlined_call_operand.vmem [shape: bf16[2,32,64], index: 10, kind: input, shape index: {}]   ;;  %s2643_s11 = inlined_call_operand.vmem [shape: f32[2,1,64], index: 11, kind: input, shape index: {}]   ;;  %s2644_s12 = inlined_call_operand.vmem [shape: bf16[2,64,32], index: 12, kind: input, shape index: {}]   ;;  %s2645_s13 = inlined_call_operand.vmem [shape: f32[2,1,32], index: 13, kind: input, shape index: {}]   ;;  %s2646_s14 = inlined_call_operand.vmem [shape: f32[2,1,32], index: 14, kind: input, shape index: {}]   ;;  %s2647_s15 = inlined_call_operand.hbm [shape: f32[2,1,32], index: 15, kind: input, shape index: {}]   ;;  %s2648_s16 = inlined_call_operand.hbm [shape: f32[2,32], index: 16, kind: output, shape index: {}]  }
   0x1   :  { %2655 = sst [smem:[#allocation20_spill]] %s2632_s0 }
   0x2   :  { %2656 = sst [smem:[#allocation21_spill]] %s2633_s1 }
   0x3   :  { %2657 = sst [smem:[#allocation22_spill]] %s2634_s2 }
   0x4   :  { %2658 = sst [smem:[#allocation23_spill]] %s2635_s3 }
   0x5   :  { %2659 = sst [smem:[#allocation24_spill]] %s2636_s4 }
   0x6   :  { %2660 = sst [smem:[#allocation25_spill]] %s2638_s6 }
   0x7   :  { %2661 = sst [smem:[#allocation26_spill]] %s2641_s9 }
   0x8   :  { %2662 = sst [smem:[#allocation27_spill]] %s2642_s10 }
   0x9   :  { %2663 = sst [smem:[#allocation28_spill]] %s2643_s11 }
   0xa   :  { %2664 = sst [smem:[#allocation29_spill]] %s2644_s12 }
   0xb   :  { %2665 = sst [smem:[#allocation30_spill]] %s2645_s13 }
   0xc   :  { %2666 = sst [smem:[#allocation31_spill]] %s2646_s14 }
   0xd   :  { %2667 = sst [smem:[#allocation32_spill]] %s2647_s15 }
   0xe   :  { %2668 = sst [smem:[#allocation33_spill]] %s2648_s16 }
   0xf   :  { %21 = vsyncpa [#allocation4], 0 }
  0x10   :  { %22 = vsyncpa [#allocation7], 0 }
  0x11   :  { %23 = vsyncpa [#allocation10], 0 }
  0x12   :  { %25 = vsyncpa [#allocation10 + $0x1], 0 }
  0x13   :  { %26 = vsyncpa [#allocation5], 0  ;;  %s2278_s21 = smov 0   ;;  %s2280_s22 = smov 0  }
  0x14   :  { %s2282_s23 = smov 0   ;;  %s2284_s24 = smov 0  }
  0x15 LB: > { %2669 = sst [smem:[#allocation17_spill]] %s2165_s23  ;;  %s2297_s25 = sadd.s32 4294967295, %s2169_s24   ;;  %s2169_s24 = sphi %s2284_s24, %s2699_s24   ;;  %s2165_s23 = sphi %s2282_s23, %s2701_s23   ;;  %s2161_s22 = sphi %s2280_s22, %s2703_s22   ;;  %s2157_s21 = sphi %s2278_s21, %s2702_s21  }
  0x16   : > { %p1679_p0 = scmp.ge.s32.totalorder %s2169_s24, 1  ;;  %p267_p1 = scmp.eq.s32.totalorder %s2297_s25, 0 }
  0x17   : > { %p454_p2 = scmp.lt.s32.totalorder %s2169_s24, 3  ;;  %p1680_p3 = scmp.ne.s32.totalorder %s2297_s25, 0 }
  0x18   : > { %s2670_s1 = sld [smem:[#allocation21_spill]]  ;;  %s2171_s30 = smov [#allocation6]  }
  0x19   : > { %p2306_p4 = pnand %p1679_p0, %p454_p2  ;;  %s481_s0 = sshll.u32 %s2171_s30, 4  ;;  %s482_s0 = int_to_ptr.vmem [resolvable:$true] %s481_s0 }
  0x1a   : > { %s2649_s18 = smov 128   ;;  %s2650_s19 = smov 8  }
  0x1b   : > { %p1788_p5 = pneg %p2306_p4  ;;  %s2324_s20 = sadd.s32 1, %s2169_s24  }
  0x1c   : > { %2673 = sst [smem:[#allocation18_spill]] %s2324_s20  ;;  %s250_s26 = ssub.s32 %s2169_s24, %s2324_s20 }
  0x1d   : > { %p2314_p6 = pnand %p1788_p5, %p267_p1  ;;  %s253_s27 = sadd.s32 1, %s2165_s23 }
  0x1e   : > { %s479_s28 = sshll.u32 %s2670_s1, 4  ;;  %p251_p7 = scmp.eq.s32.totalorder %s250_s26, 0  ;;  %s480_s28 = int_to_ptr.hbm [resolvable:$true] %s479_s28 }
  0x1f   : > { %1794 = dma.hbm_to_vmem [thread:$0]  (!%p2314_p6), %s480_s28, 256, %s482_s0, [#allocation7], %s2649_s18, %s2649_s18, %s2650_s19  }
  0x20   : > { %p260_p8 = scmp.ne.s32.totalorder %s2165_s23, %s2161_s22  ;;  %p261_p9 = scmp.eq.s32.totalorder %s2169_s24, 0 }
  0x21   : > { %p266_p10 = scmp.ne.s32.totalorder %s2161_s22, %s2157_s21  ;;  %p1808_p13 = scmp.lt.s32.totalorder %s2169_s24, 2 }
  0x22   : > { %s2334_s30 = scalar_select %p251_p7, %s2165_s23, %s253_s27  }
  0x23   : > { %p262_p11 = por %p261_p9, %p260_p8  ;;  %p2338_p12 = por %p267_p1, %p266_p10 }
  0x24   : > { %2674 = sst [smem:[#allocation19_spill]] %s2334_s30  ;;  %s544_s28 = sand.u32 1, %s2169_s24  }
  0x25   : > { %s2653_s0 = sand.u32 1, %s2165_s23   ;;  %s2676_s9 = sld [smem:[#allocation26_spill]] }
  0x26   : > { %s547_s26 = scalar_lea.vmem [#allocation9], %s2653_s0  ;;  %p2351_p0 = pnand %p1808_p13, %p262_p11 }
  0x27   : > { %s554_s2 = sshll.u32 %s547_s26, 4  ;;  %s2678_s14 = sld [smem:[#allocation20_spill]]  ;;  %s555_s2 = int_to_ptr.vmem [resolvable:$true] %s554_s2 }
  0x28   : > { %s2358_s13 = scalar_lea.sflag [#allocation10], %s544_s28  ;;  %p1979_p5 = pneg %p2351_p0 }
  0x2b   : > { %s550_s20 = scalar_lea.hbm %s2676_s9, %s2169_s24  ;;  %s1982_s30 = scalar_lea.hbm %s2676_s9, 2 }
  0x2c   : > { %s552_s16 = sshll.u32 %s550_s20, 4  ;;  %s553_s16 = int_to_ptr.hbm [resolvable:$true] %s552_s16 }
  0x2d   : > { %s465_s12 = sshll.u32 %s2678_s14, 4  ;;  %s1975_s18 = sshra.s32 %s553_s16, 4  ;;  %s466_s12 = int_to_ptr.hbm [resolvable:$true] %s465_s12  ;;  %s1976_s18 = int_to_ptr.hbm [resolvable:$true] %s1975_s18 }
  0x2e   : > { %s1977_s19 = scalar_lea.hbm %s1976_s18, 1  ;;  %p1983_p9 = scmp.lt.s32.totalorder %s1976_s18, %s2676_s9 }
  0x2f   : > { %p1978_p2 = scmp.ne.s32.totalorder %s1976_s18, %s1977_s19  ;;  %p1984_p10 = scmp.lt.s32.totalorder %s1982_s30, %s1977_s19 }
  0x31   : > { %p1980_p7 = pnand %p1979_p5, %p1978_p2  ;;  %p1985_p11 = por %p1984_p10, %p1983_p9 }
  0x33   : > { %p1981_p8 = pneg %p1980_p7 }
  0x35   : > { %p1986_p13 = pnand %p1985_p11, %p1981_p8 }
  0x37   : > { %1989 = shalt.err (!%p1986_p13)
}
  0x38   : > { %1801 = dma.hbm_to_vmem [thread:$0]  (!%p2351_p0), %s553_s16, 16, %s555_s2, %s2358_s13  }
  0x39   : > { %s2174_s14 = smov [#allocation3]   ;;  %s2679_s3 = sld [smem:[#allocation23_spill]] }
  0x3a   : > { %s467_s28 = sshll.u32 %s2174_s14, 4  ;;  %s2680_s0 = smov 8   ;;  %s468_s28 = int_to_ptr.vmem [resolvable:$true] %s467_s28 }
  0x3b   : > { %s2681_s18 = smov 128   ;;  %s2682_s15 = sld [smem:[#allocation32_spill]] }
  0x3c   : > { %1791 = dma.hbm_to_vmem [thread:$0]  (!%p2314_p6), %s466_s12, 256, %s468_s28, [#allocation4], %s2681_s18, %s2681_s18, %s2680_s0  }
  0x3d   : > { %s2175_s9 = smov [#allocation8]   ;;  %s2683_s14 = sand.u32 1, %s2165_s23  }
  0x3e   : > { %s499_s2 = sshll.u32 %s2175_s9, 4  ;;  %s598_s20 = scalar_lea.vmem [#allocation11], %s2683_s14  ;;  %s500_s2 = int_to_ptr.vmem [resolvable:$true] %s499_s2 }
  0x3f   : > { %s497_s11 = sshll.u32 %s2679_s3, 4  ;;  %s605_s26 = sshll.u32 %s598_s20, 4  ;;  %s498_s11 = int_to_ptr.hbm [resolvable:$true] %s497_s11  ;;  %s606_s26 = int_to_ptr.vmem [resolvable:$true] %s605_s26 }
  0x40   : > { %1797 = dma.hbm_to_vmem [thread:$0]  (!%p2314_p6), %s498_s11, 16, %s500_s2, [#allocation7]  }
  0x41   : > { %s601_s27 = scalar_lea.hbm %s2682_s15, %s2169_s24  ;;  %s2072_s9 = scalar_lea.hbm %s2682_s15, 2 }
  0x42   : > { %s603_s16 = sshll.u32 %s601_s27, 4  ;;  %s604_s16 = int_to_ptr.hbm [resolvable:$true] %s603_s16 }
  0x43   : > { %s2065_s3 = sshra.s32 %s604_s16, 4  ;;  %s2066_s3 = int_to_ptr.hbm [resolvable:$true] %s2065_s3 }
  0x44   : > { %s2067_s10 = scalar_lea.hbm %s2066_s3, 1  ;;  %p2073_p6 = scmp.lt.s32.totalorder %s2066_s3, %s2682_s15 }
  0x45   : > { %p2068_p2 = scmp.ne.s32.totalorder %s2066_s3, %s2067_s10  ;;  %p2074_p9 = scmp.lt.s32.totalorder %s2072_s9, %s2067_s10 }
  0x47   : > { %p2070_p7 = pnand %p2068_p2, %p1979_p5  ;;  %p2075_p10 = por %p2074_p9, %p2073_p6 }
  0x49   : > { %p2071_p8 = pneg %p2070_p7 }
  0x4b   : > { %p2076_p11 = pnand %p2075_p10, %p2071_p8 }
  0x4d   : > { %2079 = shalt.err (!%p2076_p11)
}
  0x4e   : > { %1804 = dma.hbm_to_vmem [thread:$0]  (!%p2351_p0), %s604_s16, 16, %s606_s26, %s2358_s13  }
  0x4f   : > { %614 = sbr.rel (%p2306_p4) target bundleno = 2339 (0x923), region = 84 }
  0x54   : > { %2140 = dma.done.wait (%p267_p1), [#allocation4], 256  }
  0x55   : > { %2142 = vsyncadd (%p267_p1), [#allocation4], 4294967040 }
  0x56   : > { %2144 = dma.done.wait (%p267_p1), [#allocation7], 272  }
  0x57   : > { %2146 = vsyncadd (%p267_p1), [#allocation7], 4294967024  ;;  %s631_s3 = sand.u32 1, %s2297_s25   ;;  %s633_s10 = sand.u32 1, %s2161_s22  }
  0x58   : > { %s632_s11 = scalar_lea.sflag [#allocation10], %s631_s3  ;;  %s2414_s13 = scalar_lea.vmem [#allocation9], %s633_s10 }
  0x59   : > { %2148 = dma.done.wait (%p2338_p12), %s632_s11, 32  }
  0x5a   : > { %2150 = vsyncadd (%p2338_p12), %s632_s11, 4294967264  ;;  %p729_p4 = scmp.lt.s32.totalorder %s2297_s25, 1  ;;  %s2684_s4 = sld [smem:[#allocation24_spill]] }
  0x5b   : > { %s2685_s6 = sld [smem:[#allocation25_spill]] }
  0x5c   : > { %s2422_s29 = scalar_select %p729_p4, %s2297_s25, 1 }
  0x5d   : > { %s2686_s11 = sld [smem:[#allocation27_spill]] }
  0x5e   : > { %s1754_s17 = sshll.u32 %s2422_s29, 4  ;;  %s2687_s30 = sld [smem:[#allocation28_spill]] }
  0x5f   : > { %s1757_s2 = sshll.u32 %s2422_s29, 5  ;;  %s2689_s12 = sld [smem:[#allocation29_spill]] }
  0x60   : > { %s2432_s27 = scalar_lea.vmem %s2684_s4, %s1754_s17  ;;  %s2690_s28 = sld [smem:[#allocation31_spill]] }
  0x61   : > { %s2437_s14 = scalar_lea.vmem %s2685_s6, %s1754_s17  ;;  %s2688_s6 = sld [smem:[#allocation30_spill]] }
  0x63   : > { %s2450_s21 = scalar_lea.vmem %s2686_s11, %s1754_s17  ;;  %s2470_s17 = scalar_lea.vmem [#allocation11], %s633_s10 }
  0x64   : > { %s755_s19 = scalar_lea.vmem %s2687_s30, %s2422_s29  ;;  %771 = sbr.rel (%p1680_p3) target bundleno = 383 (0x17f), region = 108 }
  0x65   : > { %s2464_s23 = scalar_lea.vmem %s2689_s12, %s1757_s2  ;;  %s2691_s10 = sld [smem:[#allocation22_spill]] (!%p1680_p3) }
  0x66   : > { %s766_s0 = scalar_lea.vmem %s2690_s28, %s2422_s29 }
  0x67   : > { %s763_s15 = scalar_lea.vmem %s2688_s6, %s2422_s29 }
  0x69   : > { %v772_v0 = vld [vmem:[#allocation3] sm:$0xff]  ;;  %vm776_vm0 = vcmask 261120   ;;  %v773_v2 = vld [vmem:[#allocation3 + $0x8] sm:$0xff]  ;;  %v2176_v4 = vmov 32.0  }
  0x6a   : > { %v777_v1 = vsel %vm776_vm0, %v772_v0, 0.0  ;;  %v780_v3 = vsel %vm776_vm0, %v773_v2, 0.0  ;;  %1870 = vrcp.f32 %v2176_v4  ;;  %v1869_v38 = vld [vmem:[#allocation8] ss:$0 sm:$0xff] }
  0x6b   : > { %778 = vadd.xlane.f32.xlu0 %v777_v1  ;;  %v1868_v35 = vld [vmem:[%s2691_s10] ss:$0 sm:$0xff] }
  0x70   : > { %v1871_v5 = vpop.eup %1870 }
  0x71   : > { %v784_v6 = vmul.f32 32.0, %v1871_v5  ;;  %vm788_vm1 = vweird.f32 %v1871_v5 }
  0x73   : > { %781 = vadd.xlane.f32.xlu0 %v780_v3  ;;  %v785_v7 = vsub.f32 1.0, %v784_v6 }
  0x75   : > { %v786_v8 = vmul.f32 %v1871_v5, %v785_v7 }
  0x77   : > { %v787_v9 = vadd.f32 %v1871_v5, %v786_v8 }
  0x79   : > { %v789_v10 = vsel %vm788_vm1, %v1871_v5, %v787_v9 }
  0xde   : > { %v779_v11 = vpop.xlane.xlu0 %778 }
  0xdf   : > { %v790_v12 = vmul.f32 %v789_v10, %v779_v11 }
  0xe1   : > { %v792_v13 = vsub.f32 %v772_v0, %v790_v12 }
  0xe3   : > { %v794_v14 = vmul.f32 %v792_v13, %v792_v13 }
  0xe5   : > { %v796_v15 = vsel %vm776_vm0, %v794_v14, 0.0 }
  0xe6   : > { %797 = vadd.xlane.f32.xlu1 %v796_v15  ;;  %v782_v16 = vpop.xlane.xlu0 %781 }
  0xe7   : > { %v791_v17 = vmul.f32 %v789_v10, %v782_v16 }
  0xe9   : > { %v793_v18 = vsub.f32 %v773_v2, %v791_v17 }
  0xeb   : > { %v795_v19 = vmul.f32 %v793_v18, %v793_v18 }
  0xed   : > { %v799_v20 = vsel %vm776_vm0, %v795_v19, 0.0 }
  0xee   : > { %800 = vadd.xlane.f32.xlu1 %v799_v20 }
 0x159   : > { %v798_v21 = vpop.xlane.xlu1 %797 }
 0x15a   : > { %v802_v22 = vmul.f32 %v798_v21, %v789_v10 }
 0x15c   : > { %v804_v23 = vadd.f32 1e-12, %v802_v22 }
 0x15e   : > { %1872 = vrsqrt.f32 %v804_v23  ;;  %vm812_vm3 = vweird.f32 %v804_v23 }
 0x161   : > { %v801_v24 = vpop.xlane.xlu1 %800 }
 0x162   : > { %v803_v25 = vmul.f32 %v801_v24, %v789_v10 }
 0x164   : > { %v1873_v26 = vpop.eup %1872  ;;  %v805_v27 = vadd.f32 1e-12, %v803_v25 }
 0x165   : > { %v807_v28 = vmul.f32 %v1873_v26, %v804_v23  ;;  %vm813_vm2 = vweird.f32 %v1873_v26 }
 0x166   : > { %1874 = vrsqrt.f32 %v805_v27  ;;  %vm814_vm4 = vmor %vm812_vm3, %vm813_vm2  ;;  %vm822_vm6 = vweird.f32 %v805_v27 }
 0x167   : > { %v808_v29 = vmul.f32 %v1873_v26, %v807_v28 }
 0x169   : > { %v809_v30 = vmul.f32 0.5, %v808_v29 }
 0x16b   : > { %v810_v31 = vsub.f32 1.5, %v809_v30 }
 0x16c   : > { %v1875_v32 = vpop.eup %1874 }
 0x16d   : > { %v811_v33 = vmul.f32 %v1873_v26, %v810_v31  ;;  %v817_v34 = vmul.f32 %v1875_v32, %v805_v27  ;;  %vm823_vm5 = vweird.f32 %v1875_v32 }
 0x16e   : > { %vm824_vm7 = vmor %vm822_vm6, %vm823_vm5 }
 0x16f   : > { %v815_v36 = vsel %vm814_vm4, %v1873_v26, %v811_v33  ;;  %v818_v37 = vmul.f32 %v1875_v32, %v817_v34 }
 0x170   : > { %v826_v39 = vmul.f32 %v815_v36, %v792_v13 }
 0x171   : > { %v819_v40 = vmul.f32 0.5, %v818_v37 }
 0x172   : > { %v831_v41 = vmul.f32 %v1868_v35, %v826_v39 }
 0x173   : > { %v820_v42 = vsub.f32 1.5, %v819_v40 }
 0x174   : > { %v836_v43 = vadd.f32 %v1869_v38, %v831_v41 }
 0x175   : > { %v821_v44 = vmul.f32 %v1875_v32, %v820_v42 }
 0x176   : > { %838 = vst.msk [vmem:[#allocation2] sm:$0xff] %vm776_vm0, %v836_v43 }
 0x177   : > { %v825_v45 = vsel %vm824_vm7, %v1875_v32, %v821_v44 }
 0x178   : > { %v827_v46 = vmul.f32 %v825_v45, %v793_v18 }
 0x17a   : > { %v832_v47 = vmul.f32 %v1868_v35, %v827_v46 }
 0x17c   : > { %v837_v48 = vadd.f32 %v1869_v38, %v832_v47 }
 0x17e   : > { %839 = vst.msk [vmem:[#allocation2 + $0x8] sm:$0xff] %vm776_vm0, %v837_v48 }
 0x17f PF: > { %v1759_v49 = vld [vmem:[%s2432_s27 + $0x8] sm:$0xff]  ;;  %v1758_v50 = vld [vmem:[%s2432_s27] sm:$0xff]  ;;  %vm863_vm8 = vcmask 261120   ;;  %s2692_s3 = scalar_lea.vmem %s2637_s5, %s2422_s29  ;;  %s2177_s27 = smov 104   ;;  %vm892_vm9 = vcmask 64512   ;;  %vm913_vm10 = vcmask 130048  }
 0x180   : > { %v2485_v51 = vld [vmem:[#allocation2] sm:$0xff]  ;;  %873 = vmatpush.bf16.msra.mxu0 %v1759_v49  ;;  %s2178_s11 = smov 120   ;;  %s2179_s18 = smov 96   ;;  %v884_v15 = vld [vmem:[#allocation6 + $0x8] sm:$0xff]  ;;  %vm1186_vm11 = vcmask 195584   ;;  %vm1385_vm3 = vcmask 523264  }
 0x181   : > { %v1891_v55 = vld [vmem:[%s2692_s3] ss:$0 sm:$0xff]  ;;  %s2180_s1 = smov 80   ;;  %s2181_s30 = smov 72  }
 0x182   : > { %s2182_s2 = smov 88   ;;  %s2183_s16 = smov 112   ;;  %v883_v11 = vld [vmem:[#allocation6] sm:$0xff] }
 0x183   : > { %s2184_s20 = smov 64   ;;  %s2185_s26 = smov 56  }
 0x184   : > { %874 = vmatpush.bf16.msra.mxu0 %v1758_v50  ;;  %s2186_s24 = smov 40   ;;  %s2187_s9 = smov 48  }
 0x185   : > { %v2487_v52 = vld [vmem:[#allocation2 + $0x8] sm:$0xff]  ;;  %s2188_s4 = smov 8   ;;  %s2189_s6 = smov 24  }
 0x186   : > { %v842_v53 = vpack.c.bf16 %v2487_v52, %v2485_v51  ;;  %s2190_s10 = smov 16   ;;  %s2693_s28 = scalar_lea.vmem %s2639_s7, %s2422_s29 }
 0x187   : > { %p1749_p1 = scmp.ne.s32.totalorder %s2297_s25, 1 }
 0x188   : > { %1705 = vmatmul.msk.bf16.vlgmr.msra.gmra.mxu0 %vm863_vm8, %v842_v53 }
 0x205   : > { %v876_v54 = vpop.f32.mrf.mxu0 }
 0x206   : > { %v877_v56 = vadd.f32 %v1891_v55, %v876_v54 }
 0x208   : > { %v881_v58 = vpack.c.bf16 %v877_v56, %v877_v56 }
 0x20a   : > { %v887_v61 = vunpack.c.l.b16 %v881_v58 }
 0x20d   : > { %v878_v57 = vpop.f32.mrf.mxu0 }
 0x20e   : > { %v879_v59 = vadd.f32 %v1891_v55, %v878_v57 }
 0x210   : > { %v882_v60 = vpack.c.bf16 %v879_v59, %v879_v59 }
 0x212   : > { %v888_v62 = vunpack.c.l.b16 %v882_v60 }
 0x214   : > { %v2497_v63 = vpack.c.b16 %v888_v62, %v887_v61 }
 0x216   : > { %1091 = vrot.lane.b32.xlu2 %v2497_v63, %s2177_s27  ;;  %957 = vrot.lane.b32.xlu1 %v2497_v63, %s2178_s11  ;;  %s2694_s27 = scalar_lea.vmem %s2640_s8, %s2422_s29 }
 0x217   : > { %890 = vrot.lane.b32.xlu0 %v2497_v63, %s2179_s18 }
 0x21e   : > { %1026 = vrot.lane.b32.xlu2 %v2497_v63, %s2180_s1  ;;  %1093 = vrot.lane.b32.xlu1 %v2497_v63, %s2181_s30 }
 0x21f   : > { %959 = vrot.lane.b32.xlu0 %v2497_v63, %s2182_s2 }
 0x227   : > { %1024 = vrot.lane.b32.xlu0 %v2497_v63, %s2183_s16 }
 0x270   : > { %v1092_v0 = vpop.permute.xlu2 %1091 }
 0x278   : > { %v1027_v1 = vpop.permute.xlu2 %1026 }
 0x279   : > { %v1032_v2 = vsel %vm892_vm9, %v1027_v1, 0 }
 0x27a   : > { %1041 = vmatpush.bf16.xpose.msrb.mxu0 %v1032_v2 }
 0x288   : > { %v958_v3 = vpop.permute.xlu1 %957 }
 0x289   : > { %v891_v4 = vpop.permute.xlu0 %890 }
 0x28a   : > { %v897_v5 = vsel %vm892_vm9, %v891_v4, 0 }
 0x28b   : > { %906 = vmatpush.bf16.xpose.msra.mxu1 %v897_v5 }
 0x290   : > { %v1094_v6 = vpop.permute.xlu1 %1093 }
 0x291   : > { %v960_v7 = vpop.permute.xlu0 %959  ;;  %v1099_v8 = vsel %vm892_vm9, %v1094_v6, 0 }
 0x292   : > { %1706 = vmatmul.msk.bf16.vlgmr.msra.gmra.mxu1 %vm892_vm9, %v2497_v63  ;;  %v965_v9 = vsel %vm892_vm9, %v960_v7, 0 }
 0x293   : > { %974 = vmatpush.bf16.xpose.msra.mxu3 %v965_v9 }
 0x299   : > { %v1025_v10 = vpop.permute.xlu0 %1024 }
 0x29a   : > { %1708 = vmatmul.msk.bf16.vlgmr.msra.gmra.mxu3 %vm892_vm9, %v958_v3  ;;  %1710 = vmatmul.msk.bf16.vlgmr.msrb.gmra.mxu0 %vm892_vm9, %v1025_v10 }
 0x29b   : > { %1108 = vmatpush.bf16.xpose.msrb.mxu3 %v1099_v8 }
 0x2aa   : > { %1712 = vmatmul.msk.bf16.vlgmr.msrb.gmra.mxu3 %vm892_vm9, %v1092_v0 }
 0x30f   : > { %v908_v12 = vpop.f32.mrf.mxu1 }
 0x310   : > { %v909_v13 = vadd.f32 %v908_v12, %v883_v11 }
 0x312   : > { %v914_v14 = vsel %vm913_vm10, %v909_v13, -inf }
 0x313   : > { %915 = vmax.xlane.f32.xlu1 %v914_v14 }
 0x317   : > { %v910_v16 = vpop.f32.mrf.mxu1  ;;  %v1043_v17 = vpop.f32.mrf.mxu0 }
 0x318   : > { %v911_v18 = vadd.f32 %v910_v16, %v884_v15  ;;  %v1044_v19 = vadd.f32 %v1043_v17, %v883_v11 }
 0x31a   : > { %v917_v20 = vsel %vm913_vm10, %v911_v18, -inf  ;;  %v1048_v21 = vsel %vm913_vm10, %v1044_v19, -inf }
 0x31b   : > { %918 = vmax.xlane.f32.xlu2 %v917_v20  ;;  %1049 = vmax.xlane.f32.xlu0 %v1048_v21 }
 0x31d   : > { %v976_v22 = vpop.f32.mrf.mxu3 }
 0x31e   : > { %v977_v23 = vadd.f32 %v976_v22, %v883_v11 }
 0x31f   : > { %v1045_v24 = vpop.f32.mrf.mxu0 }
 0x320   : > { %v1046_v25 = vadd.f32 %v1045_v24, %v884_v15  ;;  %v981_v27 = vsel %vm913_vm10, %v977_v23, -inf }
 0x322   : > { %v1051_v26 = vsel %vm913_vm10, %v1046_v25, -inf }
 0x323   : > { %1052 = vmax.xlane.f32.xlu1 %v1051_v26  ;;  %982 = vmax.xlane.f32.xlu0 %v981_v27 }
 0x325   : > { %v978_v28 = vpop.f32.mrf.mxu3 }
 0x326   : > { %v979_v29 = vadd.f32 %v978_v28, %v884_v15 }
 0x328   : > { %v984_v30 = vsel %vm913_vm10, %v979_v29, -inf }
 0x329   : > { %985 = vmax.xlane.f32.xlu2 %v984_v30 }
 0x32d   : > { %v1110_v31 = vpop.f32.mrf.mxu3 }
 0x32e   : > { %v1111_v32 = vadd.f32 %v1110_v31, %v883_v11 }
 0x330   : > { %v1115_v33 = vsel %vm913_vm10, %v1111_v32, -inf }
 0x331   : > { %1116 = vmax.xlane.f32.xlu1 %v1115_v33 }
 0x335   : > { %v1112_v34 = vpop.f32.mrf.mxu3 }
 0x336   : > { %v1113_v35 = vadd.f32 %v1112_v34, %v884_v15 }
 0x338   : > { %v1118_v36 = vsel %vm913_vm10, %v1113_v35, -inf }
 0x339   : > { %1119 = vmax.xlane.f32.xlu2 %v1118_v36 }
 0x34a   : > { %937 = vrot.lane.b32.xlu1 %v2497_v63, %s2184_s20 }
 0x351   : > { %1004 = vrot.lane.b32.xlu2 %v2497_v63, %s2185_s26 }
 0x386   : > { %v916_v37 = vpop.xlane.xlu1 %915 }
 0x387   : > { %v920_v38 = vsub.f32 %v909_v13, %v916_v37 }
 0x389   : > { %v922_v39 = vmul.f32 1.442695, %v920_v38 }
 0x38b   : > { %1899 = vpow2.f32 %v922_v39 }
 0x38e   : > { %v919_v40 = vpop.xlane.xlu2 %918  ;;  %v1050_v41 = vpop.xlane.xlu0 %1049 }
 0x38f   : > { %v921_v42 = vsub.f32 %v911_v18, %v919_v40  ;;  %v1054_v43 = vsub.f32 %v1044_v19, %v1050_v41 }
 0x391   : > { %v2525_v44 = vpop.eup %1899  ;;  %v924_v45 = vmul.f32 1.442695, %v921_v42  ;;  %v1056_v46 = vmul.f32 1.442695, %v1054_v43 }
 0x392   : > { %v926_v47 = vsel %vm913_vm10, %v2525_v44, 0.0 }
 0x393   : > { %1901 = vpow2.f32 %v924_v45  ;;  %927 = vadd.xlane.f32.xlu2 %v926_v47 }
 0x394   : > { %1903 = vpow2.f32 %v1056_v46 }
 0x396   : > { %v1053_v48 = vpop.xlane.xlu1 %1052  ;;  %v983_v49 = vpop.xlane.xlu0 %982 }
 0x397   : > { %v1055_v50 = vsub.f32 %v1046_v25, %v1053_v48  ;;  %v987_v53 = vsub.f32 %v977_v23, %v983_v49 }
 0x399   : > { %v1902_v54 = vpop.eup %1901  ;;  %v1058_v55 = vmul.f32 1.442695, %v1055_v50  ;;  %v989_v56 = vmul.f32 1.442695, %v987_v53 }
 0x39a   : > { %v2529_v57 = vpop.eup %1903  ;;  %v929_v58 = vsel %vm913_vm10, %v1902_v54, 0.0 }
 0x39b   : > { %1905 = vpow2.f32 %v1058_v55  ;;  %930 = vadd.xlane.f32.xlu0 %v929_v58  ;;  %v1060_v59 = vsel %vm913_vm10, %v2529_v57, 0.0 }
 0x39c   : > { %1907 = vpow2.f32 %v989_v56  ;;  %1061 = vadd.xlane.f32.xlu1 %v1060_v59  ;;  %v986_v60 = vpop.xlane.xlu2 %985 }
 0x39d   : > { %v988_v61 = vsub.f32 %v979_v29, %v986_v60  ;;  %v1761_v60 = vld [vmem:[%s2437_s14 + $0x8] sm:$0xff] }
 0x39e   : > { %1219 = vmatpush.bf16.msra.mxu0 %v1761_v60  ;;  %v1893_v60 = vld [vmem:[%s2694_s27] ss:$0 sm:$0xff] }
 0x39f   : > { %v991_v62 = vmul.f32 1.442695, %v988_v61  ;;  %v1760_v61 = vld [vmem:[%s2437_s14] sm:$0xff] }
 0x3a1   : > { %v2534_v0 = vpop.eup %1905  ;;  %1909 = vpow2.f32 %v991_v62 }
 0x3a2   : > { %v1908_v1 = vpop.eup %1907  ;;  %v1063_v2 = vsel %vm913_vm10, %v2534_v0, 0.0  ;;  %1220 = vmatpush.bf16.msra.mxu0 %v1760_v61 }
 0x3a3   : > { %1064 = vadd.xlane.f32.xlu0 %v1063_v2  ;;  %v993_v3 = vsel %vm913_vm10, %v1908_v1, 0.0 }
 0x3a4   : > { %994 = vadd.xlane.f32.xlu2 %v993_v3  ;;  %v1117_v4 = vpop.xlane.xlu1 %1116 }
 0x3a5   : > { %v1121_v5 = vsub.f32 %v1111_v32, %v1117_v4 }
 0x3a7   : > { %v1910_v6 = vpop.eup %1909  ;;  %v1123_v7 = vmul.f32 1.442695, %v1121_v5 }
 0x3a8   : > { %v996_v8 = vsel %vm913_vm10, %v1910_v6, 0.0 }
 0x3a9   : > { %1911 = vpow2.f32 %v1123_v7 }
 0x3ab   : > { %997 = vadd.xlane.f32.xlu0 %v996_v8 }
 0x3ac   : > { %v1120_v9 = vpop.xlane.xlu2 %1119 }
 0x3ad   : > { %v1122_v10 = vsub.f32 %v1113_v35, %v1120_v9 }
 0x3af   : > { %v1912_v11 = vpop.eup %1911  ;;  %v1125_v12 = vmul.f32 1.442695, %v1122_v10 }
 0x3b0   : > { %v1127_v13 = vsel %vm913_vm10, %v1912_v11, 0.0 }
 0x3b1   : > { %1913 = vpow2.f32 %v1125_v12 }
 0x3b3   : > { %1128 = vadd.xlane.f32.xlu0 %v1127_v13 }
 0x3b4   : > { %v1005_v17 = vpop.permute.xlu2 %1004 }
 0x3b7   : > { %v1914_v14 = vpop.eup %1913 }
 0x3b8   : > { %v1130_v15 = vsel %vm913_vm10, %v1914_v14, 0.0 }
 0x3bb   : > { %1131 = vadd.xlane.f32.xlu0 %v1130_v15  ;;  %v1892_v15 = vld [vmem:[%s2693_s28] ss:$0 sm:$0xff] }
 0x3bc   : > { %1138 = vrot.lane.b32.xlu2 %v2497_v63, %s2186_s24  ;;  %v938_v16 = vpop.permute.xlu1 %937 }
 0x3bd   : > { %950 = vmatpush.bf16.msra.mxu2 %v938_v16 }
 0x3c1   : > { %1017 = vmatpush.bf16.msrb.mxu2 %v1005_v17 }
 0x3cf   : > { %1071 = vrot.lane.b32.xlu0 %v2497_v63, %s2187_s9 }
 0x406   : > { %v928_v18 = vpop.xlane.xlu2 %927 }
 0x407   : > { %1915 = vrcp.f32 %v928_v18 }
 0x40d   : > { %v1916_v20 = vpop.eup %1915 }
 0x40e   : > { %v931_v19 = vpop.xlane.xlu0 %930  ;;  %v934_v23 = vmul.f32 %v1916_v20, %v2525_v44 }
 0x40f   : > { %1917 = vrcp.f32 %v931_v19  ;;  %v1062_v37 = vpop.xlane.xlu1 %1061 }
 0x415   : > { %v1918_v21 = vpop.eup %1917 }
 0x416   : > { %v1065_v22 = vpop.xlane.xlu0 %1064  ;;  %v935_v24 = vmul.f32 %v1918_v21, %v1902_v54 }
 0x417   : > { %v995_v25 = vpop.xlane.xlu2 %994 }
 0x418   : > { %v936_v26 = vpack.c.bf16 %v935_v24, %v934_v23  ;;  %1919 = vrcp.f32 %v995_v25  ;;  %v2191_v24 = vmov 32.0  }
 0x41a   : > { %1707 = vmatmul.msk.bf16.vlgmr.msra.gmra.mxu2 %vm913_vm10, %v936_v26 }
 0x41e   : > { %v998_v27 = vpop.xlane.xlu0 %997  ;;  %v1920_v63 = vpop.eup %1919 }
 0x41f   : > { %v1139_v28 = vpop.permute.xlu2 %1138  ;;  %1921 = vrcp.f32 %v998_v27  ;;  %v1001_v30 = vmul.f32 %v1920_v63, %v1908_v1 }
 0x420   : > { %1151 = vmatpush.bf16.msra.mxu2 %v1139_v28 }
 0x425   : > { %v1922_v29 = vpop.eup %1921 }
 0x426   : > { %v1002_v31 = vmul.f32 %v1922_v29, %v1910_v6  ;;  %v1129_v32 = vpop.xlane.xlu0 %1128 }
 0x427   : > { %1923 = vrcp.f32 %v1129_v32 }
 0x428   : > { %v1003_v33 = vpack.c.bf16 %v1002_v31, %v1001_v30 }
 0x42a   : > { %1709 = vmatmul.msk.bf16.vlgmr.msrb.gmra.mxu2 %vm913_vm10, %v1003_v33 }
 0x42d   : > { %v1924_v35 = vpop.eup %1923 }
 0x42e   : > { %v1132_v34 = vpop.xlane.xlu0 %1131  ;;  %v1135_v38 = vmul.f32 %v1924_v35, %v1912_v11 }
 0x42f   : > { %1925 = vrcp.f32 %v1132_v34 }
 0x430   : > { %1927 = vrcp.f32 %v1065_v22 }
 0x431   : > { %1929 = vrcp.f32 %v1062_v37 }
 0x432   : > { %1931 = vrcp.f32 %v2191_v24 }
 0x435   : > { %v1926_v36 = vpop.eup %1925 }
 0x436   : > { %v1136_v39 = vmul.f32 %v1926_v36, %v1914_v14  ;;  %v1928_v41 = vpop.eup %1927 }
 0x437   : > { %v1930_v42 = vpop.eup %1929  ;;  %v1069_v43 = vmul.f32 %v1928_v41, %v2534_v0 }
 0x438   : > { %v1137_v40 = vpack.c.bf16 %v1136_v39, %v1135_v38  ;;  %v1068_v44 = vmul.f32 %v1930_v42, %v2529_v57  ;;  %v1932_v25 = vpop.eup %1931  ;;  %v1763_v38 = vld [vmem:[%s2450_s21 + $0x8] sm:$0xff]  ;;  %v1762_v42 = vld [vmem:[%s2450_s21] sm:$0xff] }
 0x439   : > { %v1238_v26 = vmul.f32 32.0, %v1932_v25  ;;  %vm1242_vm12 = vweird.f32 %v1932_v25 }
 0x43a   : > { %1713 = vmatmul.msk.bf16.vlgmr.msra.gmra.mxu2 %vm913_vm10, %v1137_v40  ;;  %v1070_v46 = vpack.c.bf16 %v1069_v43, %v1068_v44 }
 0x43b   : > { %v1239_v27 = vsub.f32 1.0, %v1238_v26 }
 0x43d   : > { %v1240_v28 = vmul.f32 %v1932_v25, %v1239_v27 }
 0x43f   : > { %v1241_v63 = vadd.f32 %v1932_v25, %v1240_v28 }
 0x441   : > { %v1072_v45 = vpop.permute.xlu0 %1071 }
 0x442   : > { %1084 = vmatpush.bf16.msrb.mxu1 %v1072_v45 }
 0x445   : > { %1711 = vmatmul.msk.bf16.vlgmr.msrb.gmra.mxu1 %vm913_vm10, %v1070_v46 }
 0x446   : > { %1322 = vmatpush.bf16.msra.mxu1 %v1763_v38 }
 0x44a   : > { %1323 = vmatpush.bf16.msra.mxu1 %v1762_v42 }
 0x49d   : > { %v952_v47 = vpop.f32.mrf.mxu2 }
 0x4a5   : > { %v954_v48 = vpop.f32.mrf.mxu2 }
 0x4ad   : > { %v1019_v49 = vpop.f32.mrf.mxu2 }
 0x4b5   : > { %v1021_v50 = vpop.f32.mrf.mxu2 }
 0x4b6   : > { %v1876_v53 = vpack.i.bf16 %v1021_v50, %v1019_v49 }
 0x4b8   : > { %1877 = vrot.lane.b32.xlu2 %v1876_v53, %s2188_s4 }
 0x4bd   : > { %v1153_v54 = vpop.f32.mrf.mxu2 }
 0x4c2   : > { %v1086_v55 = vpop.f32.mrf.mxu1 }
 0x4c5   : > { %v1155_v56 = vpop.f32.mrf.mxu2 }
 0x4c6   : > { %v1886_v58 = vpack.i.bf16 %v1155_v56, %v1153_v54 }
 0x4c8   : > { %1887 = vrot.lane.b32.xlu0 %v1886_v58, %s2189_s6 }
 0x4ca   : > { %v1088_v57 = vpop.f32.mrf.mxu1 }
 0x4cb   : > { %v1881_v59 = vpack.i.bf16 %v1088_v57, %v1086_v55 }
 0x4cd   : > { %1882 = vrot.lane.b32.xlu2 %v1881_v59, %s2190_s10 }
 0x512   : > { %v1878_v62 = vpop.permute.xlu2 %1877 }
 0x513   : > { %v1880_v1 = vunpack.i.h.bf16 %v1878_v62  ;;  %v1879_v2 = vunpack.i.l.bf16 %v1878_v62 }
 0x515   : > { %v1183_v6 = vsel %vm892_vm9, %v954_v48, %v1880_v1  ;;  %v1182_v7 = vsel %vm892_vm9, %v952_v47, %v1879_v2  ;;  %v1894_v1 = vld [vmem:[%s2414_s13] ss:$0 sm:$0xff] }
 0x527   : > { %v1883_v0 = vpop.permute.xlu2 %1882 }
 0x528   : > { %v1885_v3 = vunpack.i.h.bf16 %v1883_v0  ;;  %v1884_v4 = vunpack.i.l.bf16 %v1883_v0 }
 0x52a   : > { %v1185_v10 = vsel %vm913_vm10, %v1183_v6, %v1885_v3  ;;  %v1184_v11 = vsel %vm913_vm10, %v1182_v7, %v1884_v4 }
 0x53a   : > { %v1888_v5 = vpop.permute.xlu0 %1887 }
 0x53b   : > { %v1890_v8 = vunpack.i.h.bf16 %v1888_v5  ;;  %v1889_v9 = vunpack.i.l.bf16 %v1888_v5 }
 0x53d   : > { %v1188_v12 = vsel %vm1186_vm11, %v1185_v10, %v1890_v8  ;;  %v1187_v13 = vsel %vm1186_vm11, %v1184_v11, %v1889_v9  ;;  %v1767_v8 = vld [vmem:[%s2464_s23 + $0x18] sm:$0xff]  ;;  %v1766_v9 = vld [vmem:[%s2464_s23 + $0x10] sm:$0xff]  ;;  %v1765_v10 = vld [vmem:[%s2464_s23 + $0x8] sm:$0xff] }
 0x53e   : > { %v1189_v14 = vpack.c.bf16 %v1188_v12, %v1187_v13  ;;  %1393 = vmatpush.bf16.msra.mxu3 %v1767_v8  ;;  %v1895_v11 = vld [vmem:[%s755_s19] ss:$0 sm:$0xff] }
 0x53f   : > { %v1764_v12 = vld [vmem:[%s2464_s23] sm:$0xff] }
 0x540   : > { %1722 = vmatmul.msk.bf16.vlgmr.msra.gmra.mxu0 %vm863_vm8, %v1189_v14  ;;  %v1898_v8 = vld [vmem:[%s2470_s17] ss:$0 sm:$0xff] }
 0x542   : > { %1394 = vmatpush.bf16.msra.mxu3 %v1766_v9 }
 0x546   : > { %1395 = vmatpush.bf16.msra.mxu3 %v1765_v10 }
 0x54a   : > { %1396 = vmatpush.bf16.msra.mxu3 %v1764_v12 }
 0x5bd   : > { %v1222_v16 = vpop.f32.mrf.mxu0 }
 0x5be   : > { %v1223_v17 = vadd.f32 %v1892_v15, %v1222_v16 }
 0x5c0   : > { %v1227_v18 = vadd.f32 %v1223_v17, %v2485_v51  ;;  %v2567_v51 = vsel %vm1242_vm12, %v1932_v25, %v1241_v63 }
 0x5c2   : > { %v1231_v19 = vsel %vm863_vm8, %v1227_v18, 0.0 }
 0x5c3   : > { %1232 = vadd.xlane.f32.xlu2 %v1231_v19 }
 0x5c5   : > { %v1224_v20 = vpop.f32.mrf.mxu0 }
 0x5c6   : > { %v1225_v21 = vadd.f32 %v1892_v15, %v1224_v20 }
 0x5c8   : > { %v1228_v22 = vadd.f32 %v1225_v21, %v2487_v52 }
 0x5ca   : > { %v1234_v23 = vsel %vm863_vm8, %v1228_v22, 0.0 }
 0x5cb   : > { %1235 = vadd.xlane.f32.xlu1 %v1234_v23 }
 0x636   : > { %v1233_v29 = vpop.xlane.xlu2 %1232 }
 0x637   : > { %v1244_v30 = vmul.f32 %v2567_v51, %v1233_v29 }
 0x639   : > { %v1246_v31 = vsub.f32 %v1227_v18, %v1244_v30 }
 0x63b   : > { %v1248_v52 = vmul.f32 %v1246_v31, %v1246_v31 }
 0x63d   : > { %v1250_v32 = vsel %vm863_vm8, %v1248_v52, 0.0 }
 0x63e   : > { %v1236_v33 = vpop.xlane.xlu1 %1235  ;;  %1251 = vadd.xlane.f32.xlu0 %v1250_v32 }
 0x63f   : > { %v1245_v34 = vmul.f32 %v2567_v51, %v1236_v33 }
 0x641   : > { %v1247_v35 = vsub.f32 %v1228_v22, %v1245_v34  ;;  %v1896_v34 = vld [vmem:[%s763_s15] ss:$0 sm:$0xff] }
 0x643   : > { %v1249_v36 = vmul.f32 %v1247_v35, %v1247_v35 }
 0x645   : > { %v1253_v37 = vsel %vm863_vm8, %v1249_v36, 0.0 }
 0x646   : > { %1254 = vadd.xlane.f32.xlu1 %v1253_v37 }
 0x6b1   : > { %v1252_v39 = vpop.xlane.xlu0 %1251 }
 0x6b2   : > { %v1256_v40 = vmul.f32 %v1252_v39, %v2567_v51 }
 0x6b4   : > { %v1258_v41 = vadd.f32 1e-12, %v1256_v40 }
 0x6b6   : > { %1933 = vrsqrt.f32 %v1258_v41  ;;  %vm1266_vm14 = vweird.f32 %v1258_v41 }
 0x6b9   : > { %v1255_v43 = vpop.xlane.xlu1 %1254 }
 0x6ba   : > { %v1257_v44 = vmul.f32 %v1255_v43, %v2567_v51 }
 0x6bc   : > { %v1934_v45 = vpop.eup %1933  ;;  %v1259_v46 = vadd.f32 1e-12, %v1257_v44 }
 0x6bd   : > { %v1261_v47 = vmul.f32 %v1934_v45, %v1258_v41  ;;  %vm1267_vm13 = vweird.f32 %v1934_v45 }
 0x6be   : > { %1935 = vrsqrt.f32 %v1259_v46  ;;  %vm1268_vm15 = vmor %vm1266_vm14, %vm1267_vm13  ;;  %vm1276_vm1 = vweird.f32 %v1259_v46 }
 0x6bf   : > { %v1262_v48 = vmul.f32 %v1934_v45, %v1261_v47 }
 0x6c1   : > { %v1263_v49 = vmul.f32 0.5, %v1262_v48 }
 0x6c3   : > { %v1264_v50 = vsub.f32 1.5, %v1263_v49 }
 0x6c4   : > { %v1936_v53 = vpop.eup %1935 }
 0x6c5   : > { %v1265_v54 = vmul.f32 %v1934_v45, %v1264_v50  ;;  %v1271_v55 = vmul.f32 %v1936_v53, %v1259_v46  ;;  %vm1277_vm0 = vweird.f32 %v1936_v53 }
 0x6c6   : > { %vm1278_vm2 = vmor %vm1276_vm1, %vm1277_vm0 }
 0x6c7   : > { %v1272_v56 = vmul.f32 %v1936_v53, %v1271_v55  ;;  %v1269_v58 = vsel %vm1268_vm15, %v1934_v45, %v1265_v54 }
 0x6c8   : > { %v1280_v61 = vmul.f32 %v1269_v58, %v1246_v31 }
 0x6c9   : > { %v1273_v57 = vmul.f32 0.5, %v1272_v56 }
 0x6ca   : > { %v1285_v2 = vmul.f32 %v1893_v60, %v1280_v61 }
 0x6cb   : > { %v1274_v59 = vsub.f32 1.5, %v1273_v57 }
 0x6cc   : > { %v1290_v5 = vadd.f32 %v1894_v1, %v1285_v2 }
 0x6cd   : > { %v1275_v62 = vmul.f32 %v1936_v53, %v1274_v59 }
 0x6cf   : > { %v1279_v0 = vsel %vm1278_vm2, %v1936_v53, %v1275_v62 }
 0x6d0   : > { %v1281_v3 = vmul.f32 %v1279_v0, %v1247_v35 }
 0x6d2   : > { %v1286_v4 = vmul.f32 %v1893_v60, %v1281_v3 }
 0x6d4   : > { %v1291_v6 = vadd.f32 %v1894_v1, %v1286_v4 }
 0x6d6   : > { %v1292_v7 = vpack.c.bf16 %v1291_v6, %v1290_v5 }
 0x6d8   : > { %1731 = vmatmul.msk.bf16.vlgmr.msra.gmra.mxu1 %vm863_vm8, %v1292_v7 }
 0x755   : > { %v1325_v13 = vpop.f32.mrf.mxu1 }
 0x756   : > { %v1326_v14 = vadd.f32 %v1895_v11, %v1325_v13 }
 0x758   : > { %v1332_v15 = vmul.f32 %v1326_v14, %v1326_v14  ;;  %v1330_v29 = vmul.f32 0.5, %v1326_v14 }
 0x75a   : > { %v1334_v16 = vmul.f32 %v1332_v15, %v1326_v14 }
 0x75c   : > { %v1336_v17 = vmul.f32 0.044715, %v1334_v16 }
 0x75d   : > { %v1327_v18 = vpop.f32.mrf.mxu1 }
 0x75e   : > { %v1338_v19 = vadd.f32 %v1336_v17, %v1326_v14  ;;  %v1328_v20 = vadd.f32 %v1895_v11, %v1327_v18 }
 0x760   : > { %v1333_v21 = vmul.f32 %v1328_v20, %v1328_v20  ;;  %v1340_v22 = vmul.f32 0.7978846, %v1338_v19  ;;  %v1331_v30 = vmul.f32 0.5, %v1328_v20 }
 0x762   : > { %v1335_v23 = vmul.f32 %v1333_v21, %v1328_v20  ;;  %1937 = vtanh.f32 %v1340_v22 }
 0x764   : > { %v1337_v24 = vmul.f32 0.044715, %v1335_v23 }
 0x766   : > { %v1339_v25 = vadd.f32 %v1337_v24, %v1328_v20 }
 0x768   : > { %v1341_v26 = vmul.f32 0.7978846, %v1339_v25  ;;  %v1938_v27 = vpop.eup %1937 }
 0x769   : > { %v1344_v28 = vadd.f32 1.0, %v1938_v27 }
 0x76a   : > { %1939 = vtanh.f32 %v1341_v26 }
 0x76b   : > { %v1346_v52 = vmul.f32 %v1344_v28, %v1330_v29 }
 0x770   : > { %v1940_v63 = vpop.eup %1939 }
 0x771   : > { %v1345_v31 = vadd.f32 1.0, %v1940_v63 }
 0x773   : > { %v1347_v32 = vmul.f32 %v1345_v31, %v1331_v30 }
 0x775   : > { %v1348_v33 = vpack.c.bf16 %v1347_v32, %v1346_v52 }
 0x777   : > { %1748 = vmatmul.msk.bf16.vlgmr.msra.gmra.mxu3 %vm1385_vm3, %v1348_v33 }
 0x7fa   : > { %v1398_v35 = vpop.f32.mrf.mxu3 }
 0x7fb   : > { %v1399_v36 = vadd.f32 %v1896_v34, %v1398_v35 }
 0x7fd   : > { %v1403_v37 = vadd.f32 %v1399_v36, %v1290_v5 }
 0x7ff   : > { %v1407_v38 = vsel %vm863_vm8, %v1403_v37, 0.0 }
 0x800   : > { %1408 = vadd.xlane.f32.xlu1 %v1407_v38 }
 0x802   : > { %v1400_v39 = vpop.f32.mrf.mxu3 }
 0x803   : > { %v1401_v40 = vadd.f32 %v1896_v34, %v1400_v39 }
 0x805   : > { %v1404_v41 = vadd.f32 %v1401_v40, %v1291_v6  ;;  %v1897_v6 = vld [vmem:[%s766_s0] ss:$0 sm:$0xff] }
 0x807   : > { %v1410_v42 = vsel %vm863_vm8, %v1404_v41, 0.0 }
 0x808   : > { %1411 = vadd.xlane.f32.xlu1 %v1410_v42 }
 0x873   : > { %v1409_v43 = vpop.xlane.xlu1 %1408 }
 0x874   : > { %v1413_v44 = vmul.f32 %v1409_v43, %v2567_v51 }
 0x876   : > { %v1415_v45 = vsub.f32 %v1403_v37, %v1413_v44 }
 0x878   : > { %v1417_v46 = vmul.f32 %v1415_v45, %v1415_v45 }
 0x87a   : > { %v1419_v47 = vsel %vm863_vm8, %v1417_v46, 0.0 }
 0x87b   : > { %1420 = vadd.xlane.f32.xlu1 %v1419_v47  ;;  %v1412_v48 = vpop.xlane.xlu1 %1411 }
 0x87c   : > { %v1414_v49 = vmul.f32 %v1412_v48, %v2567_v51 }
 0x87e   : > { %v1416_v50 = vsub.f32 %v1404_v41, %v1414_v49 }
 0x880   : > { %v1418_v53 = vmul.f32 %v1416_v50, %v1416_v50 }
 0x882   : > { %v1422_v54 = vsel %vm863_vm8, %v1418_v53, 0.0 }
 0x883   : > { %1423 = vadd.xlane.f32.xlu2 %v1422_v54 }
 0x8ee   : > { %v1421_v55 = vpop.xlane.xlu1 %1420 }
 0x8ef   : > { %v1425_v56 = vmul.f32 %v1421_v55, %v2567_v51 }
 0x8f1   : > { %v1427_v58 = vadd.f32 1e-12, %v1425_v56 }
 0x8f3   : > { %1941 = vrsqrt.f32 %v1427_v58  ;;  %vm1435_vm5 = vweird.f32 %v1427_v58 }
 0x8f6   : > { %v1424_v57 = vpop.xlane.xlu2 %1423 }
 0x8f7   : > { %v1426_v59 = vmul.f32 %v1424_v57, %v2567_v51 }
 0x8f9   : > { %v1942_v60 = vpop.eup %1941  ;;  %v1428_v61 = vadd.f32 1e-12, %v1426_v59 }
 0x8fa   : > { %v1430_v62 = vmul.f32 %v1942_v60, %v1427_v58  ;;  %vm1436_vm4 = vweird.f32 %v1942_v60 }
 0x8fb   : > { %1943 = vrsqrt.f32 %v1428_v61  ;;  %vm1437_vm6 = vmor %vm1435_vm5, %vm1436_vm4  ;;  %vm1445_vm9 = vweird.f32 %v1428_v61 }
 0x8fc   : > { %v1431_v0 = vmul.f32 %v1942_v60, %v1430_v62 }
 0x8fe   : > { %v1432_v1 = vmul.f32 0.5, %v1431_v0 }
 0x900   : > { %v1433_v2 = vsub.f32 1.5, %v1432_v1 }
 0x901   : > { %v1944_v3 = vpop.eup %1943 }
 0x902   : > { %v1434_v4 = vmul.f32 %v1942_v60, %v1433_v2  ;;  %v1440_v5 = vmul.f32 %v1944_v3, %v1428_v61  ;;  %vm1446_vm7 = vweird.f32 %v1944_v3 }
 0x903   : > { %vm1447_vm10 = vmor %vm1445_vm9, %vm1446_vm7 }
 0x904   : > { %v1438_v51 = vsel %vm1437_vm6, %v1942_v60, %v1434_v4  ;;  %v1441_v7 = vmul.f32 %v1944_v3, %v1440_v5 }
 0x905   : > { %v1449_v9 = vmul.f32 %v1438_v51, %v1415_v45 }
 0x906   : > { %v1442_v10 = vmul.f32 0.5, %v1441_v7 }
 0x907   : > { %v1454_v11 = vmul.f32 %v1897_v6, %v1449_v9 }
 0x908   : > { %v1443_v12 = vsub.f32 1.5, %v1442_v10 }
 0x909   : > { %v1459_v13 = vadd.f32 %v1898_v8, %v1454_v11 }
 0x90a   : > { %v1444_v14 = vmul.f32 %v1944_v3, %v1443_v12 }
 0x90b   : > { %1461 = vst.msk [vmem:[#allocation2] sm:$0xff] %vm863_vm8, %v1459_v13 }
 0x90c   : > { %v1448_v15 = vsel %vm1447_vm10, %v1944_v3, %v1444_v14 }
 0x90d   : > { %v1450_v16 = vmul.f32 %v1448_v15, %v1416_v50 }
 0x90f   : > { %v1455_v17 = vmul.f32 %v1897_v6, %v1450_v16  ;;  %1466 = sbr.rel (%p1749_p1) target bundleno = 2328 (0x918), region = 112 }
 0x911   : > { %v1460_v18 = vadd.f32 %v1898_v8, %v1455_v17 }
 0x913   : > { %1462 = vst.msk [vmem:[#allocation2 + $0x8] sm:$0xff] %vm863_vm8, %v1460_v18 }
 0x914   : > { %v1468_v19 = vrot.slane %v1460_v18, 7  ;;  %vm1470_vm11 = vcmask 1040384   ;;  %vm1472_vm12 = vcmask 254976  }
 0x916   : > { %v1471_v20 = vsel %vm1470_vm11, %v1459_v13, %v1468_v19 }
 0x917   : > { %1473 = vst.msk [vmem:[#allocation12] sm:$0x3] %vm1472_vm12, %v1471_v20 }
 0x918 PF: > { %p1812_p3 = scmp.eq.s32.totalorder %s2297_s25, 1  ;;  %s2192_s29 = smov [#allocation12]  }
 0x919   : > { %s1480_s0 = sshll.u32 %s2192_s29, 4  ;;  %s2698_s20 = sld [smem:[#allocation33_spill]]  ;;  %s1481_s0 = int_to_ptr.vmem [resolvable:$true] %s1480_s0 }
 0x91f   : > { %s1482_s26 = sshll.u32 %s2698_s20, 4  ;;  %s1483_s26 = int_to_ptr.hbm [resolvable:$true] %s1482_s26 }
 0x920   : > { %1785 = dma.vmem_to_hbm [thread:$0]  (%p1812_p3), %s1481_s0, 32, %s1483_s26, [#allocation5]  }
 0x921   : > { %2152 = dma.done.wait (%p1812_p3), [#allocation5], 32  }
 0x922   : > { %2154 = vsyncadd (%p1812_p3), [#allocation5], 4294967264 }
 0x923 PF: > { %s2699_s24 = sld [smem:[#allocation18_spill]]  ;;  %s2702_s21 = smov %s2161_s22 }
 0x924   : > { %s2700_s9 = sld [smem:[#allocation17_spill]] }
 0x925   : > { %s2701_s23 = sld [smem:[#allocation19_spill]] }
 0x929   : > { %p29_p12 = scmp.ge.s32.totalorder %s2699_s24, 4  }
 0x92a   : > { %s2703_s22 = smov %s2700_s9 }
 0x92b   :  { %31 = sbr.rel (!%p29_p12) target bundleno = 21 (0x15), region = 183 }
 0x930   :  { %1496 = vsyncpa [#allocation4], 1 }
 0x931   :  { %1498 = vsyncpa [#allocation4 + $0x1], 1 }
 0x932   :  { %1499 = vsyncpa [#allocation7], 1 }
 0x933   :  { %1500 = vsyncpa [#allocation10], 1 }
 0x934   :  { %1502 = vsyncpa [#allocation10 + $0x1], 1 }
 0x935   :  { %1503 = vsyncpa [#allocation5], 1 }
 0x936   :  { %1505 = vsyncpa [#allocation5 + $0x1], 1 }

</bundles_post_ra>
